<compile_context>
chip_gen: v7x
topology: tpu7x:2x2x1
jax: 0.10.0
libtpu: 0.0.40
codegen_flags: <defaults>
</compile_context>

<pallas_src>
import functools
import math

import jax
import jax.numpy as jnp
from jax.experimental import pallas as pl
from jax.experimental.pallas import tpu as pltpu

EPS = 1e-5
AUX = 4                  # per-row aux columns: [mask, keep_lo, keep_hi, scale]
PACK_TAPS_MAX_C = 256    # pack the 3 conv taps into one (C, 3C) RHS below this C


def _reg_head_kernel(n_layers, out_dim, pack_taps,
                     x_ref, aux_ref, wconv_ref, gamma_ref, beta_ref,
                     wreg_ref, breg_ref, out_ref):
    x = x_ref[...]                                   # (M, C) compute dtype
    M, C = x.shape
    cdtype = x.dtype

    aux = aux_ref[...]                               # (M, 4) f32
    m = aux[:, 0:1]                                  # 0/1 validity mask
    keep_lo = aux[:, 1:2] > 0.5                      # row t-1 exists in this window
    keep_hi = aux[:, 2:3] > 0.5                      # row t+1 exists in this window
    scale = aux[:, 3:4]                              # per-level Scale(), per row

    # k=3 conv taps: roll the f32 matmul OUTPUTS (no packed-bf16 sublane relayout on the
    # inputs); window-boundary rows are masked so nothing bleeds across windows/levels.
    def tap_prev(a):                                 # contribution of x[t-1]
        return jnp.where(keep_lo, pltpu.roll(a, shift=1, axis=0), 0.0)

    def tap_next(a):                                 # contribution of x[t+1]
        return jnp.where(keep_hi, pltpu.roll(a, shift=M - 1, axis=0), 0.0)

    for l in range(n_layers):                        # static unroll (n_layers == 2)
        if pack_taps:
            # one (M,C)@(C,3C) MXU push: restores MXU column fill for C < 256
            yp = jnp.dot(x, wconv_ref[l], preferred_element_type=jnp.float32)
            y = tap_prev(yp[:, :C]) + yp[:, C:2 * C] + tap_next(yp[:, 2 * C:])
        else:
            # large C: three dots, avoids the (M, 3C) f32 temp (VMEM on v7x)
            y = (tap_prev(jnp.dot(x, wconv_ref[l, 0], preferred_element_type=jnp.float32))
                 + jnp.dot(x, wconv_ref[l, 1], preferred_element_type=jnp.float32)
                 + tap_next(jnp.dot(x, wconv_ref[l, 2], preferred_element_type=jnp.float32)))
        y = y * m                                    # MaskedConv1D masking (bias=False)
        # channel LayerNorm, centered two-pass variance (matches PyTorch numerics)
        mu = jnp.mean(y, axis=-1, keepdims=True)
        r = y - mu
        var = jnp.mean(r * r, axis=-1, keepdims=True)
        # fused: normalize, affine, ReLU, cast for the next MXU pass
        x = jnp.maximum(r * (jax.lax.rsqrt(var + EPS) * gamma_ref[l]) + beta_ref[l],
                        0.0).astype(cdtype)

    # regression conv (Cout = out_dim): one packed MXU push; shift the narrow
    # (M, out_dim) tap outputs instead of the full-width activation.
    yp = jnp.dot(x, wreg_ref[...], preferred_element_type=jnp.float32)   # (M, 3*out_dim)
    off = (tap_prev(yp[:, :out_dim])
           + yp[:, out_dim:2 * out_dim]
           + tap_next(yp[:, 2 * out_dim:]))
    off = jnp.maximum(((off + breg_ref[...]) * m) * scale, 0.0)
    # lane-dense store: (out_dim, M).  With out_dim == 2 this tiny transpose is far
    # cheaper than a 2/128-lane masked vst per row.
    out_ref[...] = off.T.astype(out_ref.dtype)


def _vmem_limit_bytes():
    """Generation-aware VMEM limit: ~96 MiB on 128 MiB chips (v5e/v6e), ~48 MiB on v7x."""
    cap = 64 * 1024 * 1024
    try:
        cap = int(getattr(pltpu.get_tpu_info(), "vmem_capacity_bytes", cap))
    except Exception:
        pass
    return int(min(cap * 3 // 4, 100 * 1024 * 1024))


def _plan_blocks(total_rows, row_step, C, n_layers, out_dim, itemsize, pack_taps,
                 min_blocks=2):
    """Pick rows-per-block M and vmem limit, accounting for the resident weight footprint."""
    vmem_limit = _vmem_limit_bytes()
    # resident weights (single-buffered via pl.Buffered(1)) + LN affine + reg bias
    w_bytes = (n_layers * 3 * C * C + 3 * out_dim * C) * itemsize \
        + (2 * n_layers * C + out_dim) * 4
    # slack: the double-buffered-weights fallback path + Mosaic internal scratch
    slack = w_bytes + 2 * (1 << 20)
    per_row = (2 * C * itemsize                      # x block, double-buffered
               + 2 * 128 * 4                         # aux block (lane-padded to 128)
               + 2 * 8 * 4                           # (out_dim, M) out block (sublane-padded)
               + (4 if pack_taps else 3) * C * 4)    # in-kernel f32 temps (taps + LN)
    avail = max(vmem_limit - w_bytes - slack, row_step * per_row)
    rows_cap = max(row_step, (avail // per_row) // row_step * row_step)
    m = max(row_step, min(rows_cap, total_rows) // row_step * row_step)
    # keep >= min_blocks grid steps when there is enough work: shards blocks across v7x's
    # two TensorCores and lets the input DMA of step i+1 overlap compute on v5e/v6e.
    if total_rows >= min_blocks * row_step:
        m = min(m, max(row_step, total_rows // (min_blocks * row_step) * row_step))
    # unmasked lane-dense (out_dim, M) stores want M to be a multiple of 128
    big = row_step * 128 // math.gcd(row_step, 128)
    if m >= big:
        m = m // big * big
    return int(m), vmem_limit


def _zero_index_map(rank):
    def idx(b):
        return (0,) * rank
    return idx


def _level_rows(x, mask, scale, row_step, compute_dtype):
    """One FPN level -> time-major (rows, C) + per-row aux, padded to row_step rows."""
    bs, nw, d, vlen = x.shape
    B, T = bs * nw, vlen
    # NCW -> time-major channels-last (see TODO at top about producer-side layout).
    x_rows = x.reshape(B, d, T).transpose(0, 2, 1).reshape(B * T, d).astype(compute_dtype)
    m_rows = mask.reshape(B, T).astype(jnp.float32).reshape(B * T)
    t = jnp.arange(T, dtype=jnp.int32)
    keep_lo = jnp.tile((t > 0).astype(jnp.float32), B)       # x[t-1] is inside the window
    keep_hi = jnp.tile((t < T - 1).astype(jnp.float32), B)   # x[t+1] is inside the window
    s_rows = jnp.broadcast_to(jnp.asarray(scale, jnp.float32), (B * T,))
    aux = jnp.stack([m_rows, keep_lo, keep_hi, s_rows], axis=-1)      # (B*T, AUX)
    pad = (-(B * T)) % row_step
    if pad:
        x_rows = jnp.concatenate([x_rows, jnp.zeros((pad, d), x_rows.dtype)], axis=0)
        aux = jnp.concatenate([aux, jnp.zeros((pad, AUX), aux.dtype)], axis=0)
    return x_rows, aux, B * T


def reg_head_forward(fpn, fpn_masks, params, compute_dtype=jnp.bfloat16):
    """fpn: list of (bs, nw, d, vlen); fpn_masks: list of (bs, nw, 1, vlen) bool."""
    n_layers = params["w_conv"].shape[0]
    C = params["w_conv"].shape[-1]
    out_dim = params["w_reg"].shape[-1]
    itemsize = jnp.dtype(compute_dtype).itemsize
    sub_pack = 16 if itemsize < 4 else 8        # bf16 packs two rows per sublane word
    Ts = [int(x.shape[-1]) for x in fpn]
    # block rows must be a multiple of every level's window length (no conv halo across
    # block boundaries) and of the sublane packing factor.
    row_step = math.lcm(sub_pack, *Ts)

    xs, auxs, metas = [], [], []
    offset = 0
    for i, (x, mask) in enumerate(zip(fpn, fpn_masks)):
        xr, ar, valid = _level_rows(x, mask, params["scales"][i], row_step, compute_dtype)
        xs.append(xr)
        auxs.append(ar)
        metas.append((offset, valid, x.shape))
        offset += xr.shape[0]
    total = offset

    pack_taps = C < PACK_TAPS_MAX_C
    w_conv = params["w_conv"].astype(compute_dtype)            # (L, 3, C, C)
    if pack_taps:
        w_conv = jnp.concatenate([w_conv[:, 0], w_conv[:, 1], w_conv[:, 2]], axis=-1)
    w_reg = jnp.concatenate(
        [params["w_reg"][0], params["w_reg"][1], params["w_reg"][2]],
        axis=-1).astype(compute_dtype)                         # (C, 3*out_dim)
    b_reg = params["b_reg"].astype(jnp.float32)                # (1, out_dim)
    gamma = params["ln_gamma"].astype(jnp.float32)             # (L, 1, C)
    beta = params["ln_beta"].astype(jnp.float32)               # (L, 1, C)

    M, vmem_limit = _plan_blocks(total, row_step, C, n_layers, out_dim, itemsize, pack_taps)
    nb = pl.cdiv(total, M)
    x_all = jnp.concatenate(xs, axis=0)
    aux_all = jnp.concatenate(auxs, axis=0)
    tail = nb * M - total
    if tail:
        x_all = jnp.concatenate([x_all, jnp.zeros((tail, C), x_all.dtype)], axis=0)
        aux_all = jnp.concatenate([aux_all, jnp.zeros((tail, AUX), aux_all.dtype)], axis=0)

    kernel = functools.partial(_reg_head_kernel, n_layers, out_dim, pack_taps)
    const_shapes = [w_conv.shape, gamma.shape, beta.shape, w_reg.shape, b_reg.shape]

    def run(single_buffer_weights):
        def const_spec(shape):
            if single_buffer_weights:
                # constant block index across the grid -> one resident copy, no dead
                # double buffer (frees up to half the weight VMEM; biggest win on v7x).
                return pl.BlockSpec(shape, _zero_index_map(len(shape)),
                                    pipeline_mode=pl.Buffered(buffer_count=1))
            return pl.BlockSpec(shape, _zero_index_map(len(shape)))

        return pl.pallas_call(
            kernel,
            grid=(nb,),
            in_specs=[pl.BlockSpec((M, C), lambda b: (b, 0)),
                      pl.BlockSpec((M, AUX), lambda b: (b, 0))]
                     + [const_spec(s) for s in const_shapes],
            out_specs=pl.BlockSpec((None, out_dim, M), lambda b: (b, 0, 0)),
            out_shape=jax.ShapeDtypeStruct((nb, out_dim, M), jnp.float32),
            compiler_params=pltpu.CompilerParams(
                dimension_semantics=("parallel",),
                vmem_limit_bytes=vmem_limit,
            ),
        )(x_all, aux_all, w_conv, gamma, beta, w_reg, b_reg)

    try:
        out = run(True)
    except Exception:
        # pipeline_mode=pl.Buffered(1) not supported on this jax build: fall back to
        # default double-buffered constant operands (correctness unchanged).
        out = run(False)

    # lane-dense (nb, out_dim, M) -> row-major (rows, out_dim): layout plumbing only.
    out_rows = out.transpose(0, 2, 1).reshape(nb * M, out_dim)

    out_offsets, out_masks = (), ()
    for (row0, valid, shape), mask in zip(metas, fpn_masks):
        bs, nw, _, vlen = shape
        out_offsets += (out_rows[row0:row0 + valid].reshape(bs, nw, vlen, out_dim),)
        out_masks += (mask.reshape(bs, nw, vlen),)
    return out_offsets, out_masks


def init_params(key, embd_dim, num_fpn_levels, out_dim=2, n_layers=2):
    # Conv weights stored as (k, Cin, Cout) = PyTorch (Cout, Cin, k) transposed.
    k = jax.random.split(key, 6)
    return dict(
        w_conv=0.05 * jax.random.normal(k[0], (n_layers, 3, embd_dim, embd_dim), jnp.float32),
        ln_gamma=1.0 + 0.1 * jax.random.normal(k[1], (n_layers, 1, embd_dim), jnp.float32),
        ln_beta=0.1 * jax.random.normal(k[2], (n_layers, 1, embd_dim), jnp.float32),
        w_reg=0.05 * jax.random.normal(k[3], (3, embd_dim, out_dim), jnp.float32),
        b_reg=0.1 * jax.random.normal(k[4], (1, out_dim), jnp.float32),
        scales=1.0 + 0.1 * jax.random.normal(k[5], (num_fpn_levels,), jnp.float32),
    )


# --- plain-JAX reference (correctness check only) ---------------------------------
def _ref_level(x_btc, m_bt1, params, scale):
    def conv3(x, w3, b=None):
        z = jnp.zeros_like(x[:, :1, :])
        xm1 = jnp.concatenate([z, x[:, :-1, :]], axis=1)
        xp1 = jnp.concatenate([x[:, 1:, :], z], axis=1)
        y = (jnp.einsum("btc,cd->btd", xm1, w3[0])
             + jnp.einsum("btc,cd->btd", x, w3[1])
             + jnp.einsum("btc,cd->btd", xp1, w3[2]))
        return y if b is None else y + b

    x = x_btc
    for l in range(params["w_conv"].shape[0]):
        y = conv3(x, params["w_conv"][l]) * m_bt1
        mu = y.mean(-1, keepdims=True)
        r = y - mu
        var = (r * r).mean(-1, keepdims=True)
        y = r * jax.lax.rsqrt(var + EPS)
        y = y * params["ln_gamma"][l] + params["ln_beta"][l]
        x = jnp.maximum(y, 0.0)
    off = conv3(x, params["w_reg"], params["b_reg"]) * m_bt1
    return jnp.maximum(off * scale, 0.0)


if __name__ == "__main__":
    bs, nw, d = 2, 2, 32
    vlens = [16, 8]                              # two FPN levels
    num_fpn_levels = len(vlens)

    key = jax.random.PRNGKey(0)
    kp, *kx = jax.random.split(key, 1 + 2 * num_fpn_levels)
    params = init_params(kp, d, num_fpn_levels)

    fpn, fpn_masks = [], []
    for i, vlen in enumerate(vlens):
        x = jax.random.normal(kx[2 * i], (bs, nw, d, vlen), jnp.float32)
        tlen = jax.random.randint(kx[2 * i + 1], (bs, nw, 1, 1), vlen // 2, vlen + 1)
        mask = jnp.arange(vlen)[None, None, None, :] < tlen          # (bs, nw, 1, vlen)
        fpn.append(x)
        fpn_masks.append(mask)

    # f32 compute path: tight check against the plain-JAX reference.
    out_f32, out_masks = reg_head_forward(fpn, fpn_masks, params, compute_dtype=jnp.float32)
    jax.block_until_ready(out_f32)
    for i, vlen in enumerate(vlens):
        x_btc = fpn[i].reshape(bs * nw, d, vlen).transpose(0, 2, 1)
        m_bt1 = fpn_masks[i].reshape(bs * nw, 1, vlen).transpose(0, 2, 1).astype(jnp.float32)
        ref = _ref_level(x_btc, m_bt1, params, params["scales"][i]).reshape(bs, nw, vlen, -1)
        assert out_f32[i].shape == (bs, nw, vlen, 2)
        assert out_masks[i].shape == (bs, nw, vlen)
        assert jnp.allclose(out_f32[i], ref, atol=1e-4, rtol=1e-4), f"level {i} f32 mismatch"

    # bf16 compute path (the default; recommended on v5e/v6e/v7x): accuracy-checked
    # against the same f32 reference at bf16-appropriate tolerance.
    out_bf16, _ = reg_head_forward(fpn, fpn_masks, params)            # default bf16
    jax.block_until_ready(out_bf16)
    for i, vlen in enumerate(vlens):
        x_btc = fpn[i].reshape(bs * nw, d, vlen).transpose(0, 2, 1)
        m_bt1 = fpn_masks[i].reshape(bs * nw, 1, vlen).transpose(0, 2, 1).astype(jnp.float32)
        ref = _ref_level(x_btc, m_bt1, params, params["scales"][i]).reshape(bs, nw, vlen, -1)
        assert out_bf16[i].shape == (bs, nw, vlen, 2)
        assert bool(jnp.all(jnp.isfinite(out_bf16[i])))
        assert jnp.allclose(out_bf16[i], ref, atol=7.5e-2, rtol=7.5e-2), \
            f"level {i} bf16 mismatch"

    print("KERNEL_OK")
</pallas_src>

<mosaic_0001>
module attributes {stable_mosaic.version = 11 : i64} {
  func.func @_reg_head_kernel(%arg0: i32, %arg1: memref<48x32xf32, #tpu.memory_space<vmem>>, %arg2: memref<48x4xf32, #tpu.memory_space<vmem>>, %arg3: memref<2x32x96xf32, #tpu.memory_space<vmem>>, %arg4: memref<2x1x32xf32, #tpu.memory_space<vmem>>, %arg5: memref<2x1x32xf32, #tpu.memory_space<vmem>>, %arg6: memref<32x6xf32, #tpu.memory_space<vmem>>, %arg7: memref<1x2xf32, #tpu.memory_space<vmem>>, %arg8: memref<1x2x48xf32, #tpu.memory_space<vmem>>) attributes {dimension_semantics = [#tpu.dimension_semantics<parallel>], iteration_bounds = array<i64: 2>, scalar_prefetch = 0 : i64, scratch_operands = 0 : i64, tpu.core_type = #tpu.core_type<tc>, window_params = [{transform_indices = @transform_0, window_bounds = array<i64: 48, 32>}, {transform_indices = @transform_1, window_bounds = array<i64: 48, 4>}, {pipeline_mode = #tpu.pipeline_mode<synchronous>, transform_indices = @transform_2, window_bounds = array<i64: 2, 32, 96>}, {pipeline_mode = #tpu.pipeline_mode<synchronous>, transform_indices = @transform_3, window_bounds = array<i64: 2, 1, 32>}, {pipeline_mode = #tpu.pipeline_mode<synchronous>, transform_indices = @transform_4, window_bounds = array<i64: 2, 1, 32>}, {pipeline_mode = #tpu.pipeline_mode<synchronous>, transform_indices = @transform_5, window_bounds = array<i64: 32, 6>}, {pipeline_mode = #tpu.pipeline_mode<synchronous>, transform_indices = @transform_6, window_bounds = array<i64: 1, 2>}, {transform_indices = @transform_7, window_bounds = array<i64: 1, 2, 48>}]} {
    %c0 = arith.constant 0 : index
    %c0_0 = arith.constant 0 : index
    %0 = vector.load %arg1[%c0, %c0_0] : memref<48x32xf32, #tpu.memory_space<vmem>>, vector<48x32xf32>
    %c0_1 = arith.constant 0 : index
    %c0_2 = arith.constant 0 : index
    %1 = vector.load %arg2[%c0_1, %c0_2] : memref<48x4xf32, #tpu.memory_space<vmem>>, vector<48x4xf32>
    %2 = vector.extract_strided_slice %1 {offsets = [0, 0], sizes = [48, 1], strides = [1, 1]} : vector<48x4xf32> to vector<48x1xf32>
    %3 = vector.extract_strided_slice %1 {offsets = [0, 1], sizes = [48, 1], strides = [1, 1]} : vector<48x4xf32> to vector<48x1xf32>
    %cst = arith.constant 5.000000e-01 : f32
    %4 = vector.broadcast %cst : f32 to vector<48x1xf32>
    %5 = arith.cmpf ogt, %3, %4 : vector<48x1xf32>
    %6 = vector.extract_strided_slice %1 {offsets = [0, 2], sizes = [48, 1], strides = [1, 1]} : vector<48x4xf32> to vector<48x1xf32>
    %cst_3 = arith.constant 5.000000e-01 : f32
    %7 = vector.broadcast %cst_3 : f32 to vector<48x1xf32>
    %8 = arith.cmpf ogt, %6, %7 : vector<48x1xf32>
    %9 = vector.extract_strided_slice %1 {offsets = [0, 3], sizes = [48, 1], strides = [1, 1]} : vector<48x4xf32> to vector<48x1xf32>
    %c0_4 = arith.constant 0 : index
    %c0_5 = arith.constant 0 : index
    %c0_6 = arith.constant 0 : index
    %10 = vector.load %arg3[%c0_4, %c0_5, %c0_6] : memref<2x32x96xf32, #tpu.memory_space<vmem>>, vector<1x32x96xf32>
    %11 = vector.shape_cast %10 : vector<1x32x96xf32> to vector<32x96xf32>
    %cst_7 = arith.constant dense<0.000000e+00> : vector<48x96xf32>
    %12 = tpu.matmul %0, %11, %cst_7 {dimension_numbers = #tpu.dot_dimension_numbers<[1], [0], [0], [1], [0, 0, 1, 1], [], []>} : vector<48x32xf32>, vector<32x96xf32>, vector<48x96xf32> -> vector<48x96xf32>
    %13 = vector.extract_strided_slice %12 {offsets = [0, 0], sizes = [48, 32], strides = [1, 1]} : vector<48x96xf32> to vector<48x32xf32>
    %c1_i32 = arith.constant 1 : i32
    %14 = tpu.dynamic_rotate %13 by %c1_i32 dim 0 : vector<48x32xf32>, i32 -> vector<48x32xf32>
    %cst_8 = arith.constant 0.000000e+00 : f32
    %15 = vector.shape_cast %5 : vector<48x1xi1> to vector<48x1xi1>
    %16 = vector.broadcast %15 : vector<48x1xi1> to vector<48x32xi1>
    %17 = vector.broadcast %cst_8 : f32 to vector<48x32xf32>
    %18 = arith.select %16, %14, %17 : vector<48x32xi1>, vector<48x32xf32>
    %19 = vector.extract_strided_slice %12 {offsets = [0, 32], sizes = [48, 32], strides = [1, 1]} : vector<48x96xf32> to vector<48x32xf32>
    %20 = arith.addf %18, %19 : vector<48x32xf32>
    %21 = vector.extract_strided_slice %12 {offsets = [0, 64], sizes = [48, 32], strides = [1, 1]} : vector<48x96xf32> to vector<48x32xf32>
    %c47_i32 = arith.constant 47 : i32
    %22 = tpu.dynamic_rotate %21 by %c47_i32 dim 0 : vector<48x32xf32>, i32 -> vector<48x32xf32>
    %cst_9 = arith.constant 0.000000e+00 : f32
    %23 = vector.shape_cast %8 : vector<48x1xi1> to vector<48x1xi1>
    %24 = vector.broadcast %23 : vector<48x1xi1> to vector<48x32xi1>
    %25 = vector.broadcast %cst_9 : f32 to vector<48x32xf32>
    %26 = arith.select %24, %22, %25 : vector<48x32xi1>, vector<48x32xf32>
    %27 = arith.addf %20, %26 : vector<48x32xf32>
    %28 = vector.broadcast %2 : vector<48x1xf32> to vector<48x32xf32>
    %29 = arith.mulf %27, %28 : vector<48x32xf32>
    %cst_10 = arith.constant dense<0.000000e+00> : vector<48xf32>
    %30 = vector.multi_reduction <add>, %29, %cst_10 [1] : vector<48x32xf32> to vector<48xf32>
    %31 = vector.shape_cast %30 : vector<48xf32> to vector<48x1xf32>
    %cst_11 = arith.constant 3.200000e+01 : f32
    %32 = vector.broadcast %cst_11 : f32 to vector<48x1xf32>
    %33 = arith.divf %31, %32 : vector<48x1xf32>
    %34 = vector.broadcast %33 : vector<48x1xf32> to vector<48x32xf32>
    %35 = arith.subf %29, %34 : vector<48x32xf32>
    %36 = arith.mulf %35, %35 : vector<48x32xf32>
    %cst_12 = arith.constant dense<0.000000e+00> : vector<48xf32>
    %37 = vector.multi_reduction <add>, %36, %cst_12 [1] : vector<48x32xf32> to vector<48xf32>
    %38 = vector.shape_cast %37 : vector<48xf32> to vector<48x1xf32>
    %cst_13 = arith.constant 3.200000e+01 : f32
    %39 = vector.broadcast %cst_13 : f32 to vector<48x1xf32>
    %40 = arith.divf %38, %39 : vector<48x1xf32>
    %cst_14 = arith.constant 9.99999974E-6 : f32
    %41 = vector.broadcast %cst_14 : f32 to vector<48x1xf32>
    %42 = arith.addf %40, %41 : vector<48x1xf32>
    %43 = math.rsqrt %42 : vector<48x1xf32>
    %c0_15 = arith.constant 0 : index
    %c0_16 = arith.constant 0 : index
    %c0_17 = arith.constant 0 : index
    %44 = vector.load %arg4[%c0_15, %c0_16, %c0_17] : memref<2x1x32xf32, #tpu.memory_space<vmem>>, vector<1x1x32xf32>
    %45 = vector.shape_cast %44 : vector<1x1x32xf32> to vector<1x32xf32>
    %46 = vector.broadcast %43 : vector<48x1xf32> to vector<48x32xf32>
    %47 = vector.broadcast %45 : vector<1x32xf32> to vector<48x32xf32>
    %48 = arith.mulf %46, %47 : vector<48x32xf32>
    %49 = arith.mulf %35, %48 : vector<48x32xf32>
    %c0_18 = arith.constant 0 : index
    %c0_19 = arith.constant 0 : index
    %c0_20 = arith.constant 0 : index
    %50 = vector.load %arg5[%c0_18, %c0_19, %c0_20] : memref<2x1x32xf32, #tpu.memory_space<vmem>>, vector<1x1x32xf32>
    %51 = vector.shape_cast %50 : vector<1x1x32xf32> to vector<1x32xf32>
    %52 = vector.broadcast %51 : vector<1x32xf32> to vector<48x32xf32>
    %53 = arith.addf %49, %52 : vector<48x32xf32>
    %cst_21 = arith.constant 0.000000e+00 : f32
    %54 = vector.broadcast %cst_21 : f32 to vector<48x32xf32>
    %55 = arith.maximumf %53, %54 : vector<48x32xf32>
    %c1 = arith.constant 1 : index
    %c0_22 = arith.constant 0 : index
    %c0_23 = arith.constant 0 : index
    %56 = vector.load %arg3[%c1, %c0_22, %c0_23] : memref<2x32x96xf32, #tpu.memory_space<vmem>>, vector<1x32x96xf32>
    %57 = vector.shape_cast %56 : vector<1x32x96xf32> to vector<32x96xf32>
    %cst_24 = arith.constant dense<0.000000e+00> : vector<48x96xf32>
    %58 = tpu.matmul %55, %57, %cst_24 {dimension_numbers = #tpu.dot_dimension_numbers<[1], [0], [0], [1], [0, 0, 1, 1], [], []>} : vector<48x32xf32>, vector<32x96xf32>, vector<48x96xf32> -> vector<48x96xf32>
    %59 = vector.extract_strided_slice %58 {offsets = [0, 0], sizes = [48, 32], strides = [1, 1]} : vector<48x96xf32> to vector<48x32xf32>
    %c1_i32_25 = arith.constant 1 : i32
    %60 = tpu.dynamic_rotate %59 by %c1_i32_25 dim 0 : vector<48x32xf32>, i32 -> vector<48x32xf32>
    %cst_26 = arith.constant 0.000000e+00 : f32
    %61 = vector.shape_cast %5 : vector<48x1xi1> to vector<48x1xi1>
    %62 = vector.broadcast %61 : vector<48x1xi1> to vector<48x32xi1>
    %63 = vector.broadcast %cst_26 : f32 to vector<48x32xf32>
    %64 = arith.select %62, %60, %63 : vector<48x32xi1>, vector<48x32xf32>
    %65 = vector.extract_strided_slice %58 {offsets = [0, 32], sizes = [48, 32], strides = [1, 1]} : vector<48x96xf32> to vector<48x32xf32>
    %66 = arith.addf %64, %65 : vector<48x32xf32>
    %67 = vector.extract_strided_slice %58 {offsets = [0, 64], sizes = [48, 32], strides = [1, 1]} : vector<48x96xf32> to vector<48x32xf32>
    %c47_i32_27 = arith.constant 47 : i32
    %68 = tpu.dynamic_rotate %67 by %c47_i32_27 dim 0 : vector<48x32xf32>, i32 -> vector<48x32xf32>
    %cst_28 = arith.constant 0.000000e+00 : f32
    %69 = vector.shape_cast %8 : vector<48x1xi1> to vector<48x1xi1>
    %70 = vector.broadcast %69 : vector<48x1xi1> to vector<48x32xi1>
    %71 = vector.broadcast %cst_28 : f32 to vector<48x32xf32>
    %72 = arith.select %70, %68, %71 : vector<48x32xi1>, vector<48x32xf32>
    %73 = arith.addf %66, %72 : vector<48x32xf32>
    %74 = vector.broadcast %2 : vector<48x1xf32> to vector<48x32xf32>
    %75 = arith.mulf %73, %74 : vector<48x32xf32>
    %cst_29 = arith.constant dense<0.000000e+00> : vector<48xf32>
    %76 = vector.multi_reduction <add>, %75, %cst_29 [1] : vector<48x32xf32> to vector<48xf32>
    %77 = vector.shape_cast %76 : vector<48xf32> to vector<48x1xf32>
    %cst_30 = arith.constant 3.200000e+01 : f32
    %78 = vector.broadcast %cst_30 : f32 to vector<48x1xf32>
    %79 = arith.divf %77, %78 : vector<48x1xf32>
    %80 = vector.broadcast %79 : vector<48x1xf32> to vector<48x32xf32>
    %81 = arith.subf %75, %80 : vector<48x32xf32>
    %82 = arith.mulf %81, %81 : vector<48x32xf32>
    %cst_31 = arith.constant dense<0.000000e+00> : vector<48xf32>
    %83 = vector.multi_reduction <add>, %82, %cst_31 [1] : vector<48x32xf32> to vector<48xf32>
    %84 = vector.shape_cast %83 : vector<48xf32> to vector<48x1xf32>
    %cst_32 = arith.constant 3.200000e+01 : f32
    %85 = vector.broadcast %cst_32 : f32 to vector<48x1xf32>
    %86 = arith.divf %84, %85 : vector<48x1xf32>
    %cst_33 = arith.constant 9.99999974E-6 : f32
    %87 = vector.broadcast %cst_33 : f32 to vector<48x1xf32>
    %88 = arith.addf %86, %87 : vector<48x1xf32>
    %89 = math.rsqrt %88 : vector<48x1xf32>
    %c1_34 = arith.constant 1 : index
    %c0_35 = arith.constant 0 : index
    %c0_36 = arith.constant 0 : index
    %90 = vector.load %arg4[%c1_34, %c0_35, %c0_36] : memref<2x1x32xf32, #tpu.memory_space<vmem>>, vector<1x1x32xf32>
    %91 = vector.shape_cast %90 : vector<1x1x32xf32> to vector<1x32xf32>
    %92 = vector.broadcast %89 : vector<48x1xf32> to vector<48x32xf32>
    %93 = vector.broadcast %91 : vector<1x32xf32> to vector<48x32xf32>
    %94 = arith.mulf %92, %93 : vector<48x32xf32>
    %95 = arith.mulf %81, %94 : vector<48x32xf32>
    %c1_37 = arith.constant 1 : index
    %c0_38 = arith.constant 0 : index
    %c0_39 = arith.constant 0 : index
    %96 = vector.load %arg5[%c1_37, %c0_38, %c0_39] : memref<2x1x32xf32, #tpu.memory_space<vmem>>, vector<1x1x32xf32>
    %97 = vector.shape_cast %96 : vector<1x1x32xf32> to vector<1x32xf32>
    %98 = vector.broadcast %97 : vector<1x32xf32> to vector<48x32xf32>
    %99 = arith.addf %95, %98 : vector<48x32xf32>
    %cst_40 = arith.constant 0.000000e+00 : f32
    %100 = vector.broadcast %cst_40 : f32 to vector<48x32xf32>
    %101 = arith.maximumf %99, %100 : vector<48x32xf32>
    %c0_41 = arith.constant 0 : index
    %c0_42 = arith.constant 0 : index
    %102 = vector.load %arg6[%c0_41, %c0_42] : memref<32x6xf32, #tpu.memory_space<vmem>>, vector<32x6xf32>
    %cst_43 = arith.constant dense<0.000000e+00> : vector<48x6xf32>
    %103 = tpu.matmul %101, %102, %cst_43 {dimension_numbers = #tpu.dot_dimension_numbers<[1], [0], [0], [1], [0, 0, 1, 1], [], []>} : vector<48x32xf32>, vector<32x6xf32>, vector<48x6xf32> -> vector<48x6xf32>
    %104 = vector.extract_strided_slice %103 {offsets = [0, 0], sizes = [48, 2], strides = [1, 1]} : vector<48x6xf32> to vector<48x2xf32>
    %c1_i32_44 = arith.constant 1 : i32
    %105 = tpu.dynamic_rotate %104 by %c1_i32_44 dim 0 : vector<48x2xf32>, i32 -> vector<48x2xf32>
    %cst_45 = arith.constant 0.000000e+00 : f32
    %106 = vector.shape_cast %5 : vector<48x1xi1> to vector<48x1xi1>
    %107 = vector.broadcast %106 : vector<48x1xi1> to vector<48x2xi1>
    %108 = vector.broadcast %cst_45 : f32 to vector<48x2xf32>
    %109 = arith.select %107, %105, %108 : vector<48x2xi1>, vector<48x2xf32>
    %110 = vector.extract_strided_slice %103 {offsets = [0, 2], sizes = [48, 2], strides = [1, 1]} : vector<48x6xf32> to vector<48x2xf32>
    %111 = arith.addf %109, %110 : vector<48x2xf32>
    %112 = vector.extract_strided_slice %103 {offsets = [0, 4], sizes = [48, 2], strides = [1, 1]} : vector<48x6xf32> to vector<48x2xf32>
    %c47_i32_46 = arith.constant 47 : i32
    %113 = tpu.dynamic_rotate %112 by %c47_i32_46 dim 0 : vector<48x2xf32>, i32 -> vector<48x2xf32>
    %cst_47 = arith.constant 0.000000e+00 : f32
    %114 = vector.shape_cast %8 : vector<48x1xi1> to vector<48x1xi1>
    %115 = vector.broadcast %114 : vector<48x1xi1> to vector<48x2xi1>
    %116 = vector.broadcast %cst_47 : f32 to vector<48x2xf32>
    %117 = arith.select %115, %113, %116 : vector<48x2xi1>, vector<48x2xf32>
    %118 = arith.addf %111, %117 : vector<48x2xf32>
    %c0_48 = arith.constant 0 : index
    %c0_49 = arith.constant 0 : index
    %119 = vector.load %arg7[%c0_48, %c0_49] : memref<1x2xf32, #tpu.memory_space<vmem>>, vector<1x2xf32>
    %120 = vector.broadcast %119 : vector<1x2xf32> to vector<48x2xf32>
    %121 = arith.addf %118, %120 : vector<48x2xf32>
    %122 = vector.broadcast %2 : vector<48x1xf32> to vector<48x2xf32>
    %123 = arith.mulf %121, %122 : vector<48x2xf32>
    %124 = vector.broadcast %9 : vector<48x1xf32> to vector<48x2xf32>
    %125 = arith.mulf %123, %124 : vector<48x2xf32>
    %cst_50 = arith.constant 0.000000e+00 : f32
    %126 = vector.broadcast %cst_50 : f32 to vector<48x2xf32>
    %127 = arith.maximumf %125, %126 : vector<48x2xf32>
    %128 = tpu.transpose %127, [1, 0] : vector<48x2xf32> -> vector<2x48xf32>
    %c0_51 = arith.constant 0 : index
    %c0_52 = arith.constant 0 : index
    %c0_53 = arith.constant 0 : index
    %129 = vector.load %arg8[%c0_51, %c0_52, %c0_53] : memref<1x2x48xf32, #tpu.memory_space<vmem>>, vector<1x2x48xf32>
    %130 = vector.shape_cast %129 : vector<1x2x48xf32> to vector<2x48xf32>
    %131 = vector.shape_cast %128 : vector<2x48xf32> to vector<1x2x48xf32>
    tpu.vector_store %arg8[%c0_51, %c0_52, %c0_53], %131 {strides = array<i32>} : memref<1x2x48xf32, #tpu.memory_space<vmem>>, vector<1x2x48xf32>,
    return
  }
  func.func @transform_0(%arg0: i32) -> (i32, i32) {
    %c0_i32 = arith.constant 0 : i32
    %c0_i32_0 = arith.constant 0 : i32
    return %arg0, %c0_i32 : i32, i32
  }
  func.func @transform_1(%arg0: i32) -> (i32, i32) {
    %c0_i32 = arith.constant 0 : i32
    %c0_i32_0 = arith.constant 0 : i32
    return %arg0, %c0_i32 : i32, i32
  }
  func.func @transform_2(%arg0: i32) -> (i32, i32, i32) {
    %c0_i32 = arith.constant 0 : i32
    %c0_i32_0 = arith.constant 0 : i32
    %c0_i32_1 = arith.constant 0 : i32
    %c0_i32_2 = arith.constant 0 : i32
    return %c0_i32, %c0_i32_0, %c0_i32_1 : i32, i32, i32
  }
  func.func @transform_3(%arg0: i32) -> (i32, i32, i32) {
    %c0_i32 = arith.constant 0 : i32
    %c0_i32_0 = arith.constant 0 : i32
    %c0_i32_1 = arith.constant 0 : i32
    %c0_i32_2 = arith.constant 0 : i32
    return %c0_i32, %c0_i32_0, %c0_i32_1 : i32, i32, i32
  }
  func.func @transform_4(%arg0: i32) -> (i32, i32, i32) {
    %c0_i32 = arith.constant 0 : i32
    %c0_i32_0 = arith.constant 0 : i32
    %c0_i32_1 = arith.constant 0 : i32
    %c0_i32_2 = arith.constant 0 : i32
    return %c0_i32, %c0_i32_0, %c0_i32_1 : i32, i32, i32
  }
  func.func @transform_5(%arg0: i32) -> (i32, i32) {
    %c0_i32 = arith.constant 0 : i32
    %c0_i32_0 = arith.constant 0 : i32
    %c0_i32_1 = arith.constant 0 : i32
    return %c0_i32, %c0_i32_0 : i32, i32
  }
  func.func @transform_6(%arg0: i32) -> (i32, i32) {
    %c0_i32 = arith.constant 0 : i32
    %c0_i32_0 = arith.constant 0 : i32
    %c0_i32_1 = arith.constant 0 : i32
    return %c0_i32, %c0_i32_0 : i32, i32
  }
  func.func @transform_7(%arg0: i32) -> (i32, i32, i32) {
    %c0_i32 = arith.constant 0 : i32
    %c0_i32_0 = arith.constant 0 : i32
    %c0_i32_1 = arith.constant 0 : i32
    return %arg0, %c0_i32, %c0_i32_0 : i32, i32, i32
  }
}

module attributes {stable_mosaic.version = 11 : i64} {
  func.func @_reg_head_kernel(%arg0: i32, %arg1: memref<48x32xf32, #tpu.memory_space<vmem>>, %arg2: memref<48x4xf32, #tpu.memory_space<vmem>>, %arg3: memref<2x32x96xf32, #tpu.memory_space<vmem>>, %arg4: memref<2x1x32xf32, #tpu.memory_space<vmem>>, %arg5: memref<2x1x32xf32, #tpu.memory_space<vmem>>, %arg6: memref<32x6xf32, #tpu.memory_space<vmem>>, %arg7: memref<1x2xf32, #tpu.memory_space<vmem>>, %arg8: memref<1x2x48xf32, #tpu.memory_space<vmem>>) attributes {dimension_semantics = [#tpu.dimension_semantics<parallel>], iteration_bounds = array<i64: 2>, scalar_prefetch = 0 : i64, scratch_operands = 0 : i64, tpu.core_type = #tpu.core_type<tc>, window_params = [{transform_indices = @transform_0, window_bounds = array<i64: 48, 32>}, {transform_indices = @transform_1, window_bounds = array<i64: 48, 4>}, {pipeline_mode = #tpu.pipeline_mode<synchronous>, transform_indices = @transform_2, window_bounds = array<i64: 2, 32, 96>}, {pipeline_mode = #tpu.pipeline_mode<synchronous>, transform_indices = @transform_3, window_bounds = array<i64: 2, 1, 32>}, {pipeline_mode = #tpu.pipeline_mode<synchronous>, transform_indices = @transform_4, window_bounds = array<i64: 2, 1, 32>}, {pipeline_mode = #tpu.pipeline_mode<synchronous>, transform_indices = @transform_5, window_bounds = array<i64: 32, 6>}, {pipeline_mode = #tpu.pipeline_mode<synchronous>, transform_indices = @transform_6, window_bounds = array<i64: 1, 2>}, {transform_indices = @transform_7, window_bounds = array<i64: 1, 2, 48>}]} {
    %c0 = arith.constant 0 : index
    %c0_0 = arith.constant 0 : index
    %0 = vector.load %arg1[%c0, %c0_0] : memref<48x32xf32, #tpu.memory_space<vmem>>, vector<48x32xf32>
    %c0_1 = arith.constant 0 : index
    %c0_2 = arith.constant 0 : index
    %1 = vector.load %arg2[%c0_1, %c0_2] : memref<48x4xf32, #tpu.memory_space<vmem>>, vector<48x4xf32>
    %2 = vector.extract_strided_slice %1 {offsets = [0, 0], sizes = [48, 1], strides = [1, 1]} : vector<48x4xf32> to vector<48x1xf32>
    %3 = vector.extract_strided_slice %1 {offsets = [0, 1], sizes = [48, 1], strides = [1, 1]} : vector<48x4xf32> to vector<48x1xf32>
    %cst = arith.constant 5.000000e-01 : f32
    %4 = vector.broadcast %cst : f32 to vector<48x1xf32>
    %5 = arith.cmpf ogt, %3, %4 : vector<48x1xf32>
    %6 = vector.extract_strided_slice %1 {offsets = [0, 2], sizes = [48, 1], strides = [1, 1]} : vector<48x4xf32> to vector<48x1xf32>
    %cst_3 = arith.constant 5.000000e-01 : f32
    %7 = vector.broadcast %cst_3 : f32 to vector<48x1xf32>
    %8 = arith.cmpf ogt, %6, %7 : vector<48x1xf32>
    %9 = vector.extract_strided_slice %1 {offsets = [0, 3], sizes = [48, 1], strides = [1, 1]} : vector<48x4xf32> to vector<48x1xf32>
    %c0_4 = arith.constant 0 : index
    %c0_5 = arith.constant 0 : index
    %c0_6 = arith.constant 0 : index
    %10 = vector.load %arg3[%c0_4, %c0_5, %c0_6] : memref<2x32x96xf32, #tpu.memory_space<vmem>>, vector<1x32x96xf32>
    %11 = vector.shape_cast %10 : vector<1x32x96xf32> to vector<32x96xf32>
    %cst_7 = arith.constant dense<0.000000e+00> : vector<48x96xf32>
    %12 = tpu.matmul %0, %11, %cst_7 {dimension_numbers = #tpu.dot_dimension_numbers<[1], [0], [0], [1], [0, 0, 1, 1], [], []>} : vector<48x32xf32>, vector<32x96xf32>, vector<48x96xf32> -> vector<48x96xf32>
    %13 = vector.extract_strided_slice %12 {offsets = [0, 0], sizes = [48, 32], strides = [1, 1]} : vector<48x96xf32> to vector<48x32xf32>
    %c1_i32 = arith.constant 1 : i32
    %14 = tpu.dynamic_rotate %13 by %c1_i32 dim 0 : vector<48x32xf32>, i32 -> vector<48x32xf32>
    %cst_8 = arith.constant 0.000000e+00 : f32
    %15 = vector.shape_cast %5 : vector<48x1xi1> to vector<48x1xi1>
    %16 = vector.broadcast %15 : vector<48x1xi1> to vector<48x32xi1>
    %17 = vector.broadcast %cst_8 : f32 to vector<48x32xf32>
    %18 = arith.select %16, %14, %17 : vector<48x32xi1>, vector<48x32xf32>
    %19 = vector.extract_strided_slice %12 {offsets = [0, 32], sizes = [48, 32], strides = [1, 1]} : vector<48x96xf32> to vector<48x32xf32>
    %20 = arith.addf %18, %19 : vector<48x32xf32>
    %21 = vector.extract_strided_slice %12 {offsets = [0, 64], sizes = [48, 32], strides = [1, 1]} : vector<48x96xf32> to vector<48x32xf32>
    %c47_i32 = arith.constant 47 : i32
    %22 = tpu.dynamic_rotate %21 by %c47_i32 dim 0 : vector<48x32xf32>, i32 -> vector<48x32xf32>
    %cst_9 = arith.constant 0.000000e+00 : f32
    %23 = vector.shape_cast %8 : vector<48x1xi1> to vector<48x1xi1>
    %24 = vector.broadcast %23 : vector<48x1xi1> to vector<48x32xi1>
    %25 = vector.broadcast %cst_9 : f32 to vector<48x32xf32>
    %26 = arith.select %24, %22, %25 : vector<48x32xi1>, vector<48x32xf32>
    %27 = arith.addf %20, %26 : vector<48x32xf32>
    %28 = vector.broadcast %2 : vector<48x1xf32> to vector<48x32xf32>
    %29 = arith.mulf %27, %28 : vector<48x32xf32>
    %cst_10 = arith.constant dense<0.000000e+00> : vector<48xf32>
    %30 = vector.multi_reduction <add>, %29, %cst_10 [1] : vector<48x32xf32> to vector<48xf32>
    %31 = vector.shape_cast %30 : vector<48xf32> to vector<48x1xf32>
    %cst_11 = arith.constant 3.200000e+01 : f32
    %32 = vector.broadcast %cst_11 : f32 to vector<48x1xf32>
    %33 = arith.divf %31, %32 : vector<48x1xf32>
    %34 = vector.broadcast %33 : vector<48x1xf32> to vector<48x32xf32>
    %35 = arith.subf %29, %34 : vector<48x32xf32>
    %36 = arith.mulf %35, %35 : vector<48x32xf32>
    %cst_12 = arith.constant dense<0.000000e+00> : vector<48xf32>
    %37 = vector.multi_reduction <add>, %36, %cst_12 [1] : vector<48x32xf32> to vector<48xf32>
    %38 = vector.shape_cast %37 : vector<48xf32> to vector<48x1xf32>
    %cst_13 = arith.constant 3.200000e+01 : f32
    %39 = vector.broadcast %cst_13 : f32 to vector<48x1xf32>
    %40 = arith.divf %38, %39 : vector<48x1xf32>
    %cst_14 = arith.constant 9.99999974E-6 : f32
    %41 = vector.broadcast %cst_14 : f32 to vector<48x1xf32>
    %42 = arith.addf %40, %41 : vector<48x1xf32>
    %43 = math.rsqrt %42 : vector<48x1xf32>
    %c0_15 = arith.constant 0 : index
    %c0_16 = arith.constant 0 : index
    %c0_17 = arith.constant 0 : index
    %44 = vector.load %arg4[%c0_15, %c0_16, %c0_17] : memref<2x1x32xf32, #tpu.memory_space<vmem>>, vector<1x1x32xf32>
    %45 = vector.shape_cast %44 : vector<1x1x32xf32> to vector<1x32xf32>
    %46 = vector.broadcast %43 : vector<48x1xf32> to vector<48x32xf32>
    %47 = vector.broadcast %45 : vector<1x32xf32> to vector<48x32xf32>
    %48 = arith.mulf %46, %47 : vector<48x32xf32>
    %49 = arith.mulf %35, %48 : vector<48x32xf32>
    %c0_18 = arith.constant 0 : index
    %c0_19 = arith.constant 0 : index
    %c0_20 = arith.constant 0 : index
    %50 = vector.load %arg5[%c0_18, %c0_19, %c0_20] : memref<2x1x32xf32, #tpu.memory_space<vmem>>, vector<1x1x32xf32>
    %51 = vector.shape_cast %50 : vector<1x1x32xf32> to vector<1x32xf32>
    %52 = vector.broadcast %51 : vector<1x32xf32> to vector<48x32xf32>
    %53 = arith.addf %49, %52 : vector<48x32xf32>
    %cst_21 = arith.constant 0.000000e+00 : f32
    %54 = vector.broadcast %cst_21 : f32 to vector<48x32xf32>
    %55 = arith.maximumf %53, %54 : vector<48x32xf32>
    %c1 = arith.constant 1 : index
    %c0_22 = arith.constant 0 : index
    %c0_23 = arith.constant 0 : index
    %56 = vector.load %arg3[%c1, %c0_22, %c0_23] : memref<2x32x96xf32, #tpu.memory_space<vmem>>, vector<1x32x96xf32>
    %57 = vector.shape_cast %56 : vector<1x32x96xf32> to vector<32x96xf32>
    %cst_24 = arith.constant dense<0.000000e+00> : vector<48x96xf32>
    %58 = tpu.matmul %55, %57, %cst_24 {dimension_numbers = #tpu.dot_dimension_numbers<[1], [0], [0], [1], [0, 0, 1, 1], [], []>} : vector<48x32xf32>, vector<32x96xf32>, vector<48x96xf32> -> vector<48x96xf32>
    %59 = vector.extract_strided_slice %58 {offsets = [0, 0], sizes = [48, 32], strides = [1, 1]} : vector<48x96xf32> to vector<48x32xf32>
    %c1_i32_25 = arith.constant 1 : i32
    %60 = tpu.dynamic_rotate %59 by %c1_i32_25 dim 0 : vector<48x32xf32>, i32 -> vector<48x32xf32>
    %cst_26 = arith.constant 0.000000e+00 : f32
    %61 = vector.shape_cast %5 : vector<48x1xi1> to vector<48x1xi1>
    %62 = vector.broadcast %61 : vector<48x1xi1> to vector<48x32xi1>
    %63 = vector.broadcast %cst_26 : f32 to vector<48x32xf32>
    %64 = arith.select %62, %60, %63 : vector<48x32xi1>, vector<48x32xf32>
    %65 = vector.extract_strided_slice %58 {offsets = [0, 32], sizes = [48, 32], strides = [1, 1]} : vector<48x96xf32> to vector<48x32xf32>
    %66 = arith.addf %64, %65 : vector<48x32xf32>
    %67 = vector.extract_strided_slice %58 {offsets = [0, 64], sizes = [48, 32], strides = [1, 1]} : vector<48x96xf32> to vector<48x32xf32>
    %c47_i32_27 = arith.constant 47 : i32
    %68 = tpu.dynamic_rotate %67 by %c47_i32_27 dim 0 : vector<48x32xf32>, i32 -> vector<48x32xf32>
    %cst_28 = arith.constant 0.000000e+00 : f32
    %69 = vector.shape_cast %8 : vector<48x1xi1> to vector<48x1xi1>
    %70 = vector.broadcast %69 : vector<48x1xi1> to vector<48x32xi1>
    %71 = vector.broadcast %cst_28 : f32 to vector<48x32xf32>
    %72 = arith.select %70, %68, %71 : vector<48x32xi1>, vector<48x32xf32>
    %73 = arith.addf %66, %72 : vector<48x32xf32>
    %74 = vector.broadcast %2 : vector<48x1xf32> to vector<48x32xf32>
    %75 = arith.mulf %73, %74 : vector<48x32xf32>
    %cst_29 = arith.constant dense<0.000000e+00> : vector<48xf32>
    %76 = vector.multi_reduction <add>, %75, %cst_29 [1] : vector<48x32xf32> to vector<48xf32>
    %77 = vector.shape_cast %76 : vector<48xf32> to vector<48x1xf32>
    %cst_30 = arith.constant 3.200000e+01 : f32
    %78 = vector.broadcast %cst_30 : f32 to vector<48x1xf32>
    %79 = arith.divf %77, %78 : vector<48x1xf32>
    %80 = vector.broadcast %79 : vector<48x1xf32> to vector<48x32xf32>
    %81 = arith.subf %75, %80 : vector<48x32xf32>
    %82 = arith.mulf %81, %81 : vector<48x32xf32>
    %cst_31 = arith.constant dense<0.000000e+00> : vector<48xf32>
    %83 = vector.multi_reduction <add>, %82, %cst_31 [1] : vector<48x32xf32> to vector<48xf32>
    %84 = vector.shape_cast %83 : vector<48xf32> to vector<48x1xf32>
    %cst_32 = arith.constant 3.200000e+01 : f32
    %85 = vector.broadcast %cst_32 : f32 to vector<48x1xf32>
    %86 = arith.divf %84, %85 : vector<48x1xf32>
    %cst_33 = arith.constant 9.99999974E-6 : f32
    %87 = vector.broadcast %cst_33 : f32 to vector<48x1xf32>
    %88 = arith.addf %86, %87 : vector<48x1xf32>
    %89 = math.rsqrt %88 : vector<48x1xf32>
    %c1_34 = arith.constant 1 : index
    %c0_35 = arith.constant 0 : index
    %c0_36 = arith.constant 0 : index
    %90 = vector.load %arg4[%c1_34, %c0_35, %c0_36] : memref<2x1x32xf32, #tpu.memory_space<vmem>>, vector<1x1x32xf32>
    %91 = vector.shape_cast %90 : vector<1x1x32xf32> to vector<1x32xf32>
    %92 = vector.broadcast %89 : vector<48x1xf32> to vector<48x32xf32>
    %93 = vector.broadcast %91 : vector<1x32xf32> to vector<48x32xf32>
    %94 = arith.mulf %92, %93 : vector<48x32xf32>
    %95 = arith.mulf %81, %94 : vector<48x32xf32>
    %c1_37 = arith.constant 1 : index
    %c0_38 = arith.constant 0 : index
    %c0_39 = arith.constant 0 : index
    %96 = vector.load %arg5[%c1_37, %c0_38, %c0_39] : memref<2x1x32xf32, #tpu.memory_space<vmem>>, vector<1x1x32xf32>
    %97 = vector.shape_cast %96 : vector<1x1x32xf32> to vector<1x32xf32>
    %98 = vector.broadcast %97 : vector<1x32xf32> to vector<48x32xf32>
    %99 = arith.addf %95, %98 : vector<48x32xf32>
    %cst_40 = arith.constant 0.000000e+00 : f32
    %100 = vector.broadcast %cst_40 : f32 to vector<48x32xf32>
    %101 = arith.maximumf %99, %100 : vector<48x32xf32>
    %c0_41 = arith.constant 0 : index
    %c0_42 = arith.constant 0 : index
    %102 = vector.load %arg6[%c0_41, %c0_42] : memref<32x6xf32, #tpu.memory_space<vmem>>, vector<32x6xf32>
    %cst_43 = arith.constant dense<0.000000e+00> : vector<48x6xf32>
    %103 = tpu.matmul %101, %102, %cst_43 {dimension_numbers = #tpu.dot_dimension_numbers<[1], [0], [0], [1], [0, 0, 1, 1], [], []>} : vector<48x32xf32>, vector<32x6xf32>, vector<48x6xf32> -> vector<48x6xf32>
    %104 = vector.extract_strided_slice %103 {offsets = [0, 0], sizes = [48, 2], strides = [1, 1]} : vector<48x6xf32> to vector<48x2xf32>
    %c1_i32_44 = arith.constant 1 : i32
    %105 = tpu.dynamic_rotate %104 by %c1_i32_44 dim 0 : vector<48x2xf32>, i32 -> vector<48x2xf32>
    %cst_45 = arith.constant 0.000000e+00 : f32
    %106 = vector.shape_cast %5 : vector<48x1xi1> to vector<48x1xi1>
    %107 = vector.broadcast %106 : vector<48x1xi1> to vector<48x2xi1>
    %108 = vector.broadcast %cst_45 : f32 to vector<48x2xf32>
    %109 = arith.select %107, %105, %108 : vector<48x2xi1>, vector<48x2xf32>
    %110 = vector.extract_strided_slice %103 {offsets = [0, 2], sizes = [48, 2], strides = [1, 1]} : vector<48x6xf32> to vector<48x2xf32>
    %111 = arith.addf %109, %110 : vector<48x2xf32>
    %112 = vector.extract_strided_slice %103 {offsets = [0, 4], sizes = [48, 2], strides = [1, 1]} : vector<48x6xf32> to vector<48x2xf32>
    %c47_i32_46 = arith.constant 47 : i32
    %113 = tpu.dynamic_rotate %112 by %c47_i32_46 dim 0 : vector<48x2xf32>, i32 -> vector<48x2xf32>
    %cst_47 = arith.constant 0.000000e+00 : f32
    %114 = vector.shape_cast %8 : vector<48x1xi1> to vector<48x1xi1>
    %115 = vector.broadcast %114 : vector<48x1xi1> to vector<48x2xi1>
    %116 = vector.broadcast %cst_47 : f32 to vector<48x2xf32>
    %117 = arith.select %115, %113, %116 : vector<48x2xi1>, vector<48x2xf32>
    %118 = arith.addf %111, %117 : vector<48x2xf32>
    %c0_48 = arith.constant 0 : index
    %c0_49 = arith.constant 0 : index
    %119 = vector.load %arg7[%c0_48, %c0_49] : memref<1x2xf32, #tpu.memory_space<vmem>>, vector<1x2xf32>
    %120 = vector.broadcast %119 : vector<1x2xf32> to vector<48x2xf32>
    %121 = arith.addf %118, %120 : vector<48x2xf32>
    %122 = vector.broadcast %2 : vector<48x1xf32> to vector<48x2xf32>
    %123 = arith.mulf %121, %122 : vector<48x2xf32>
    %124 = vector.broadcast %9 : vector<48x1xf32> to vector<48x2xf32>
    %125 = arith.mulf %123, %124 : vector<48x2xf32>
    %cst_50 = arith.constant 0.000000e+00 : f32
    %126 = vector.broadcast %cst_50 : f32 to vector<48x2xf32>
    %127 = arith.maximumf %125, %126 : vector<48x2xf32>
    %128 = tpu.transpose %127, [1, 0] : vector<48x2xf32> -> vector<2x48xf32>
    %c0_51 = arith.constant 0 : index
    %c0_52 = arith.constant 0 : index
    %c0_53 = arith.constant 0 : index
    %129 = vector.load %arg8[%c0_51, %c0_52, %c0_53] : memref<1x2x48xf32, #tpu.memory_space<vmem>>, vector<1x2x48xf32>
    %130 = vector.shape_cast %129 : vector<1x2x48xf32> to vector<2x48xf32>
    %131 = vector.shape_cast %128 : vector<2x48xf32> to vector<1x2x48xf32>
    tpu.vector_store %arg8[%c0_51, %c0_52, %c0_53], %131 {strides = array<i32>} : memref<1x2x48xf32, #tpu.memory_space<vmem>>, vector<1x2x48xf32>,
    return
  }
  func.func @transform_0(%arg0: i32) -> (i32, i32) {
    %c0_i32 = arith.constant 0 : i32
    %c0_i32_0 = arith.constant 0 : i32
    return %arg0, %c0_i32 : i32, i32
  }
  func.func @transform_1(%arg0: i32) -> (i32, i32) {
    %c0_i32 = arith.constant 0 : i32
    %c0_i32_0 = arith.constant 0 : i32
    return %arg0, %c0_i32 : i32, i32
  }
  func.func @transform_2(%arg0: i32) -> (i32, i32, i32) {
    %c0_i32 = arith.constant 0 : i32
    %c0_i32_0 = arith.constant 0 : i32
    %c0_i32_1 = arith.constant 0 : i32
    %c0_i32_2 = arith.constant 0 : i32
    return %c0_i32, %c0_i32_0, %c0_i32_1 : i32, i32, i32
  }
  func.func @transform_3(%arg0: i32) -> (i32, i32, i32) {
    %c0_i32 = arith.constant 0 : i32
    %c0_i32_0 = arith.constant 0 : i32
    %c0_i32_1 = arith.constant 0 : i32
    %c0_i32_2 = arith.constant 0 : i32
    return %c0_i32, %c0_i32_0, %c0_i32_1 : i32, i32, i32
  }
  func.func @transform_4(%arg0: i32) -> (i32, i32, i32) {
    %c0_i32 = arith.constant 0 : i32
    %c0_i32_0 = arith.constant 0 : i32
    %c0_i32_1 = arith.constant 0 : i32
    %c0_i32_2 = arith.constant 0 : i32
    return %c0_i32, %c0_i32_0, %c0_i32_1 : i32, i32, i32
  }
  func.func @transform_5(%arg0: i32) -> (i32, i32) {
    %c0_i32 = arith.constant 0 : i32
    %c0_i32_0 = arith.constant 0 : i32
    %c0_i32_1 = arith.constant 0 : i32
    return %c0_i32, %c0_i32_0 : i32, i32
  }
  func.func @transform_6(%arg0: i32) -> (i32, i32) {
    %c0_i32 = arith.constant 0 : i32
    %c0_i32_0 = arith.constant 0 : i32
    %c0_i32_1 = arith.constant 0 : i32
    return %c0_i32, %c0_i32_0 : i32, i32
  }
  func.func @transform_7(%arg0: i32) -> (i32, i32, i32) {
    %c0_i32 = arith.constant 0 : i32
    %c0_i32_0 = arith.constant 0 : i32
    %c0_i32_1 = arith.constant 0 : i32
    return %arg0, %c0_i32, %c0_i32_0 : i32, i32, i32
  }
}

</mosaic_0001>

<bundles_post_ra>
// kernel: tpu_custom_call.1
= control target key start
LH: loop header
LB: loop body
LE: loop exit
PB: predicated region body
PF: predicated region fallthrough
CT: control target
= control target key end

     0   :  { %12 = vsyncpa [#allocation3], 0  ;;  %s2366_s0 = inlined_call_operand.vmem [shape: f32[96,32], index: 0, kind: input, shape index: {}]   ;;  %s2367_s1 = inlined_call_operand.vmem [shape: f32[96,4], index: 1, kind: input, shape index: {}]   ;;  %s2368_s2 = inlined_call_operand.vmem [shape: f32[2,32,96], index: 2, kind: input, shape index: {}]   ;;  %s2369_s3 = inlined_call_operand.vmem [shape: f32[2,1,32], index: 3, kind: input, shape index: {}]   ;;  %s2370_s4 = inlined_call_operand.vmem [shape: f32[2,1,32], index: 4, kind: input, shape index: {}]   ;;  %s2371_s5 = inlined_call_operand.vmem [shape: f32[32,6], index: 5, kind: input, shape index: {}]   ;;  %s2372_s6 = inlined_call_operand.vmem [shape: f32[1,2], index: 6, kind: input, shape index: {}]   ;;  %s2373_s7 = inlined_call_operand.hbm [shape: f32[2,2,48], index: 7, kind: output, shape index: {}]  }
   0x1   :  { %14 = vsyncpa [#allocation3 + $0x1], 0  ;;  %s1784_s24 = smov 0   ;;  %s1786_s25 = smov 0  }
   0x2   :  { %s1788_s26 = smov 0   ;;  %s1790_s27 = smov 0  }
   0x3 LB: > { %s1805_s28 = sadd.s32 4294967295, %s1733_s27   ;;  %s1439_s29 = sadd.s32 4294967294, %s1733_s27   ;;  %s1733_s27 = sphi %s1790_s27, %s2379_s27   ;;  %s1729_s26 = sphi %s1788_s26, %s2378_s26   ;;  %s1725_s25 = sphi %s1786_s25, %s2377_s25   ;;  %s1721_s24 = sphi %s1784_s24, %s2376_s24  }
   0x4   : > { %s1809_s30 = sadd.s32 1, %s1733_s27   ;;  %s184_s8 = sadd.s32 1, %s1729_s26 }
   0x5   : > { %s181_s9 = ssub.s32 %s1733_s27, %s1809_s30  ;;  %p194_p0 = scmp.ne.s32.totalorder %s1729_s26, %s1725_s25 }
   0x6   : > { %p182_p1 = scmp.eq.s32.totalorder %s181_s9, 0  ;;  %p195_p2 = scmp.eq.s32.totalorder %s1805_s28, 1 }
   0x7   : > { %p200_p3 = scmp.ne.s32.totalorder %s1725_s25, %s1721_s24  ;;  %p201_p4 = scmp.eq.s32.totalorder %s1439_s29, 1 }
   0x8   : > { %s1820_s10 = scalar_select %p182_p1, %s1729_s26, %s184_s8  }
   0x9   : > { %p1822_p5 = por %p195_p2, %p194_p0  ;;  %p1826_p6 = por %p201_p4, %p200_p3 }
   0xa   : > { %p1442_p7 = scmp.ge.s32.totalorder %s1733_s27, 1  ;;  %p252_p8 = scmp.lt.s32.totalorder %s1733_s27, 3 }
   0xc   : > { %p253_p9 = pnand %p1442_p7, %p252_p8 }
   0xd   : > { %v319_v0 = vld [vmem:[%s2368_s2] sm:$0xff] (!%p253_p9)  ;;  %v320_v1 = vld [vmem:[%s2368_s2 + $0x8] sm:$0xff] (!%p253_p9)  ;;  %v321_v2 = vld [vmem:[%s2368_s2 + $0x10] sm:$0xff] (!%p253_p9)  ;;  %s289_s19 = smul.u32 (!%p253_p9), 6, %s1805_s28  ;;  %v1735_v5 = vmov (!%p253_p9), 2   ;;  %v1736_v7 = vmov (!%p253_p9), 0   ;;  %v443_v27 = vlaneseq (!%p253_p9) }
   0xe   : > { %256 = sbr.rel (%p253_p9) target bundleno = 1852 (0x73c), region = 48  ;;  %v1560_v3 = vpack.c.bf16 (!%p253_p9), %v320_v1, %v319_v0  ;;  %v322_v4 = vld [vmem:[%s2368_s2 + $0x18] sm:$0xff] (!%p253_p9)  ;;  %1636 = vset.pattern.permute.xlu1 (!%p253_p9), %v1735_v5  ;;  %1640 = vset.pattern.permute.xlu0 (!%p253_p9), %v1736_v7  ;;  %vm323_vm0 = vcmask (!%p253_p9), 261120   ;;  %v1737_v19 = vmov (!%p253_p9), 1   ;;  %s1738_s15 = smov (!%p253_p9), 96  }
   0xf   : > { %v1564_v6 = vpack.c.bf16 (!%p253_p9), %v322_v4, %v321_v2  ;;  %p290_p10 = scmp.lt.s32.totalorder (!%p253_p9), %s289_s19, 11  ;;  %v1897_v28 = vshrl.u32 (!%p253_p9), %v443_v27, 7  ;;  %s1739_s16 = smov (!%p253_p9), 64  }
  0x10   : > { %1561 = vmatprep.subr.bf16.mxu0 (!%p253_p9), %v1560_v3  ;;  %1584 = vmatprep.subr.bf16.mxu1 (!%p253_p9), %v1560_v3  ;;  %s1741_s13 = smov (!%p253_p9), 126   ;;  %s286_s17 = sand.u32 (!%p253_p9), 1, %s1725_s25  }
  0x11   : > { %1563 = vmatpush3.bf16.msra.mxu0 (!%p253_p9), %v1560_v3  ;;  %1586 = vmatpush3.bf16.msra.mxu1 (!%p253_p9), %v1560_v3  ;;  %vm445_vm7 = vcmp.lt.s32.totalorder (!%p253_p9), %v1897_v28, 1  ;;  %vm542_vm8 = vcmp.lt.s32.totalorder (!%p253_p9), %v1897_v28, 7  ;;  %s1443_s18 = sshll.u32 (!%p253_p9), %s286_s17, 1 }
  0x12   : > { %1565 = vmatprep.subr.bf16.mxu0 (!%p253_p9), %v1564_v6  ;;  %1585 = vmatprep.subr.bf16.mxu1 (!%p253_p9), %v1564_v6  ;;  %s288_s20 = scalar_lea.vmem (!%p253_p9), [#allocation2], %s1443_s18 }
  0x13   : > { %s1368_s21 = sshll.u32 (!%p253_p9), %s288_s20, 4  ;;  %s2326_s21 = int_to_ptr.vmem [resolvable:$true] %s1368_s21 }
  0x14   : > { %s1671_s9 = scalar_lea.vmem (!%p253_p9), %s2326_s21, 32 }
  0x15   : > { %s2381_s19 = smov (!%p290_p10, %s289_s19), 11  ;;  %1567 = vmatpush3.bf16.msra.mxu0 %v1564_v6  ;;  %1587 = vmatpush3.bf16.msra.mxu1 %v1564_v6  ;;  %p1672_p11 = scmp.ne.s32.totalorder %s2326_s21, %s1671_s9 }
  0x16   : > { %s1444_s22 = sshll.u32 %s2381_s19, 3  ;;  %s1476_s19 = sshll.u32 %s1805_s28, 5 }
  0x17   : > { %s293_s8 = scalar_lea.vmem %s2366_s0, %s1444_s22  ;;  %s1852_s14 = scalar_lea.vmem %s2367_s1, %s1444_s22 }
  0x18   : > { %v301_v8 = vld [vmem:[%s293_s8] sm:$0xff]  ;;  %v302_v9 = vld [vmem:[%s293_s8 + $0x8] sm:$0xff]  ;;  %v303_v12 = vld [vmem:[%s293_s8 + $0x10] sm:$0xff]  ;;  %s2324_s29 = scalar_lea.hbm %s2373_s7, %s1476_s19  ;;  %p1673_p12 = pnand %p1672_p11, %p1822_p5 }
  0x19   : > { %v305_v10 = vld [vmem:[%s293_s8 + $0x20] sm:$0xff]  ;;  %1517 = vmatprep.mubr.msk.f32.mxu0 %vm323_vm0, %v301_v8  ;;  %v306_v11 = vld [vmem:[%s293_s8 + $0x28] sm:$0xff]  ;;  %v304_v15 = vld [vmem:[%s293_s8 + $0x18] sm:$0xff]  ;;  %s1355_s8 = scalar_lea.sflag [#allocation3], %s286_s17  ;;  %s1743_s28 = smov [#allocation2]  }
  0x1a   : > { %1523 = vmatprep.mubr.msk.f32.mxu1 %vm323_vm0, %v305_v10  ;;  %v1857_v13 = vld [vmem:[%s1852_s14] sm:$0xff]  ;;  %v1860_v14 = vld [vmem:[%s1852_s14 + $0x8] sm:$0xff]  ;;  %1518 = vmatmul.mubr.msk.f32.vlgmr.msra.gmra.mrb[0].mxu0 %vm323_vm0, %v302_v9  ;;  %v1870_v17 = vld [vmem:[%s1852_s14 + $0x18] sm:$0xff]  ;;  %p1674_p13 = pneg %p1673_p12 }
  0x1b   : > { %1524 = vmatmul.mubr.msk.f32.vlgmr.msra.gmra.mrb[0].mxu1 %vm323_vm0, %v306_v11  ;;  %vm313_vm1 = vcmp.gt.f32.partialorder %v1857_v13, 0.5  ;;  %vm314_vm2 = vcmp.gt.f32.partialorder %v1860_v14, 0.5  ;;  %1520 = vmatprep.mubr.msk.f32.mxu0 %vm323_vm0, %v303_v12  ;;  %vm316_vm3 = vcmp.gt.f32.partialorder %v1870_v17, 0.5  ;;  %v1876_v20 = vld [vmem:[%s1852_s14 + $0x10] sm:$0xff]  ;;  %v1881_v22 = vld [vmem:[%s1852_s14 + $0x28] sm:$0xff]  ;;  %v1889_v25 = vld [vmem:[%s1852_s14 + $0x20] sm:$0xff] }
  0x1c   : > { %v452_v16 = vsel %vm313_vm1, 1, %v1736_v7  ;;  %592 = vperm.xlu0 %1640, %v1860_v14   ;;  %v453_v18 = vsel %vm314_vm2, 1, %v1736_v7  ;;  %v455_v21 = vsel %vm316_vm3, 1, %v1736_v7  ;;  %vm315_vm4 = vcmp.gt.f32.partialorder %v1876_v20, 0.5  ;;  %s1742_s14 = smov 124  }
  0x1d   : > { %550 = vperm.xlu1 %1636, %v452_v16   ;;  %v454_v23 = vsel %vm315_vm4, 1, %v1736_v7  ;;  %vm318_vm5 = vcmp.gt.f32.partialorder %v1881_v22, 0.5  ;;  %vm317_vm6 = vcmp.gt.f32.partialorder %v1889_v25, 0.5 }
  0x1e   : > { %1521 = vmatmul.mubr.msk.f32.gmra.mrb[2].mxu0 %vm323_vm0, %v304_v15  ;;  %v457_v24 = vsel %vm318_vm5, 1, %v1736_v7  ;;  %v456_v26 = vsel %vm317_vm6, 1, %v1736_v7 }
  0x20   : > { %1641 = vset.pattern.permute.xlu0 %v1737_v19 }
  0x21   : > { %553 = vperm.xlu1 %1636, %v453_v18   ;;  %459 = vperm.xlu0 %1641, %v452_v16  }
  0x25   : > { %1637 = vset.pattern.permute.xlu1 %v1737_v19  ;;  %462 = vperm.xlu0 %1641, %v453_v18  }
  0x26   : > { %468 = vperm.xlu1 %1637, %v455_v21  }
  0x29   : > { %465 = vperm.xlu0 %1641, %v454_v23  }
  0x2a   : > { %1638 = vset.pattern.permute.xlu1 %v1736_v7 }
  0x2b   : > { %587 = vperm.xlu1 %1638, %v1857_v13  }
  0x2d   : > { %474 = vperm.xlu0 %1641, %v457_v24  }
  0x2f   : > { %1639 = vset.pattern.permute.xlu1 %v1735_v5 }
  0x30   : > { %559 = vperm.xlu1 %1639, %v455_v21  }
  0x31   : > { %1643 = vset.pattern.permute.xlu0 %v1735_v5 }
  0x32   : > { %556 = vperm.xlu0 %1643, %v454_v23  }
  0x34   : > { %1642 = vset.pattern.permute.xlu1 %v1737_v19 }
  0x35   : > { %471 = vperm.xlu1 %1642, %v456_v26  }
  0x36   : > { %562 = vperm.xlu0 %1643, %v456_v26  }
  0x39   : > { %1644 = vset.pattern.permute.xlu1 %v1736_v7 }
  0x3a   : > { %597 = vperm.xlu1 %1644, %v1876_v20   ;;  %565 = vperm.xlu0 %1643, %v457_v24  }
  0x3e   : > { %602 = vperm.xlu1 %1644, %v1870_v17  }
  0x42   : > { %607 = vperm.xlu1 %1644, %v1889_v25  }
  0x9b   : > { %v1935_v48 = vpop.permute.xlu0 %592 }
  0x9c   : > { %v1933_v47 = vpop.permute.xlu1 %550 }
  0x9d   : > { %vm567_vm10 = vcmp.eq.s32.totalorder %v1933_v47, 1 }
  0xa0   : > { %v1937_v49 = vpop.permute.xlu1 %553  ;;  %v1939_v50 = vpop.permute.xlu0 %459 }
  0xa1   : > { %vm476_vm9 = vcmp.eq.s32.totalorder %v1939_v50, 1  ;;  %vm568_vm13 = vcmp.eq.s32.totalorder %v1937_v49, 1 }
  0xa4   : > { %v1943_v52 = vpop.permute.xlu0 %462 }
  0xa5   : > { %v1941_v51 = vpop.permute.xlu1 %468  ;;  %vm477_vm12 = vcmp.eq.s32.totalorder %v1943_v52, 1 }
  0xa6   : > { %vm479_vm14 = vcmp.eq.s32.totalorder %v1941_v51, 1 }
  0xa8   : > { %v1947_v54 = vpop.permute.xlu0 %465 }
  0xa9   : > { %vm478_vm15 = vcmp.eq.s32.totalorder %v1947_v54, 1 }
  0xaa   : > { %v1945_v53 = vpop.permute.xlu1 %587 }
  0xac   : > { %v1951_v56 = vpop.permute.xlu0 %474 }
  0xad   : > { %vm481_vm4 = vcmp.eq.s32.totalorder %v1951_v56, 1 }
  0xaf   : > { %v1949_v55 = vpop.permute.xlu1 %559 }
  0xb0   : > { %vm570_vm1 = vcmp.eq.s32.totalorder %v1949_v55, 1 }
  0xb1   : > { %v1955_v58 = vpop.permute.xlu0 %556 }
  0xb2   : > { %vm569_vm2 = vcmp.eq.s32.totalorder %v1955_v58, 1 }
  0xb4   : > { %v1953_v57 = vpop.permute.xlu1 %471 }
  0xb5   : > { %v1959_v60 = vpop.permute.xlu0 %562  ;;  %vm480_vm11 = vcmp.eq.s32.totalorder %v1953_v57, 1 }
  0xb6   : > { %vm571_vm3 = vcmp.eq.s32.totalorder %v1959_v60, 1 }
  0xb9   : > { %v1957_v59 = vpop.permute.xlu1 %597  ;;  %v1963_v62 = vpop.permute.xlu0 %565 }
  0xba   : > { %vm572_vm5 = vcmp.eq.s32.totalorder %v1963_v62, 1 }
  0xbd   : > { %v1961_v61 = vpop.permute.xlu1 %602 }
  0xc1   : > { %v1965_v63 = vpop.permute.xlu1 %607 }
  0xed   : > { %v1519_v29 = vpop.f32.mrb[0].mxu0 }
  0xee   : > { %v1525_v30 = vpop.f32.mrb[0].mxu1  ;;  %v438_v31 = vrot.slane %v1519_v29, 7  ;;  %496 = vrot.lane.b32.xlu1 %v1519_v29, %s1738_s15  ;;  %520 = vrot.lane.b32.xlu0 %v1519_v29, %s1739_s16  ;;  %v408_v33 = vpop.f32.mrb[1].mxu0 }
  0xef   : > { %v442_v32 = vrot.slane %v1525_v30, 7  ;;  %v428_v34 = vpop.f32.mrb[1].mxu1  ;;  %v437_v35 = vrot.slane %v408_v33, 7 }
  0xf0   : > { %v441_v36 = vrot.slane %v428_v34, 7 }
  0xf1   : > { %v1522_v37 = vpop.f32.mrb[2].mxu0  ;;  %v1904_v38 = vsel %vm445_vm7, %v437_v35, %v438_v31  ;;  %v451_v39 = vsel %vm445_vm7, %v442_v32, %v437_v35 }
  0xf2   : > { %v1910_v40 = vsel %vm445_vm7, %v441_v36, %v442_v32  ;;  %v440_v41 = vrot.slane %v1522_v37, 7  ;;  %528 = vrot.lane.b32.xlu0 %v1525_v30, %s1739_s16  ;;  %518 = vrot.lane.b32.xlu1 %v408_v33, %s1739_s16  ;;  %v418_v42 = vpop.f32.mrb[3].mxu0  ;;  %v482_v9 = vsel %vm476_vm9, %v451_v39, 0.0 }
  0xf3   : > { %v439_v43 = vrot.slane %v418_v42, 7 }
  0xf4   : > { %v447_v44 = vsel %vm445_vm7, %v440_v41, %v441_v36 }
  0xf5   : > { %v1918_v45 = vsel %vm445_vm7, %v439_v43, %v440_v41  ;;  %v1922_v46 = vsel %vm445_vm7, %v438_v31, %v439_v43  ;;  %v486_v27 = vsel %vm480_vm11, %v447_v44, 0.0 }
  0xf6   : > { %526 = vrot.lane.b32.xlu0 %v428_v34, %s1739_s16  ;;  %494 = vrot.lane.b32.xlu1 %v408_v33, %s1738_s15  ;;  %v485_v36 = vsel %vm479_vm14, %v1918_v45, 0.0  ;;  %v484_v43 = vsel %vm478_vm15, %v1922_v46, 0.0 }
  0xfa   : > { %500 = vrot.lane.b32.xlu0 %v1522_v37, %s1738_s15  ;;  %524 = vrot.lane.b32.xlu1 %v1522_v37, %s1739_s16 }
  0xfe   : > { %502 = vrot.lane.b32.xlu0 %v428_v34, %s1738_s15  ;;  %522 = vrot.lane.b32.xlu1 %v418_v42, %s1739_s16  ;;  %v483_v34 = vsel %vm477_vm12, %v1904_v38, 0.0 }
 0x102   : > { %498 = vrot.lane.b32.xlu1 %v418_v42, %s1738_s15 }
 0x106   : > { %612 = vperm.xlu1 %1644, %v1881_v22  }
 0x10a   : > { %504 = vrot.lane.b32.xlu1 %v1525_v30, %s1738_s15 }
 0x160   : > { %v497_v0 = vpop.permute.xlu1 %496  ;;  %v521_v1 = vpop.permute.xlu0 %520 }
 0x161   : > { %v537_v4 = vrot.slane %v521_v1, 1  ;;  %v513_v35 = vadd.f32 %v497_v0, %v483_v34 }
 0x164   : > { %v1967_v2 = vpop.permute.xlu0 %528  ;;  %v1969_v3 = vpop.permute.xlu1 %518 }
 0x165   : > { %v536_v5 = vrot.slane %v1969_v3, 1  ;;  %v541_v23 = vrot.slane %v1967_v2, 1 }
 0x167   : > { %v547_v6 = vsel %vm542_vm8, %v536_v5, %v537_v4 }
 0x168   : > { %v527_v7 = vpop.permute.xlu0 %526  ;;  %v495_v8 = vpop.permute.xlu1 %494  ;;  %v573_v11 = vsel %vm567_vm10, %v547_v6, 0.0 }
 0x169   : > { %v512_v10 = vadd.f32 %v495_v8, %v482_v9  ;;  %v540_v18 = vrot.slane %v527_v7, 1 }
 0x16b   : > { %v579_v12 = vadd.f32 %v573_v11, %v512_v10  ;;  %v543_v31 = vsel %vm542_vm8, %v540_v18, %v541_v23 }
 0x16c   : > { %v501_v15 = vpop.permute.xlu0 %500  ;;  %v525_v16 = vpop.permute.xlu1 %524  ;;  %v577_v41 = vsel %vm571_vm3, %v543_v31, 0.0 }
 0x16d   : > { %v539_v19 = vrot.slane %v525_v16, 1  ;;  %v615_v21 = vmul.f32 %v1945_v53, %v579_v12  ;;  %v515_v45 = vadd.f32 %v501_v15, %v485_v36 }
 0x16f   : > { %v621_v24 = vsel %vm323_vm0, %v615_v21, 0.0  ;;  %v544_v30 = vsel %vm542_vm8, %v539_v19, %v540_v18 }
 0x170   : > { %622 = vadd.xlane.f32.xlu0 %v621_v24  ;;  %v503_v26 = vpop.permute.xlu0 %502  ;;  %v523_v29 = vpop.permute.xlu1 %522  ;;  %v576_v44 = vsel %vm570_vm1, %v544_v30, 0.0  ;;  %v487_v24 = vsel %vm481_vm4, %v1910_v40, 0.0 }
 0x171   : > { %v516_v32 = vadd.f32 %v503_v26, %v486_v27  ;;  %v538_v33 = vrot.slane %v523_v29, 1  ;;  %v582_v8 = vadd.f32 %v576_v44, %v515_v45 }
 0x173   : > { %v546_v37 = vsel %vm542_vm8, %v537_v4, %v538_v33  ;;  %v545_v39 = vsel %vm542_vm8, %v538_v33, %v539_v19  ;;  %v583_v0 = vadd.f32 %v577_v41, %v516_v32  ;;  %v618_v12 = vmul.f32 %v1961_v61, %v582_v8 }
 0x174   : > { %v499_v42 = vpop.permute.xlu1 %498  ;;  %v574_v38 = vsel %vm568_vm13, %v546_v37, 0.0  ;;  %v575_v4 = vsel %vm569_vm2, %v545_v39, 0.0  ;;  %v548_v19 = vsel %vm542_vm8, %v541_v23, %v536_v5 }
 0x175   : > { %v514_v1 = vadd.f32 %v499_v42, %v484_v43  ;;  %v580_v2 = vadd.f32 %v574_v38, %v513_v35  ;;  %v619_v10 = vmul.f32 %v1965_v63, %v583_v0  ;;  %v630_v16 = vsel %vm323_vm0, %v618_v12, 0.0 }
 0x176   : > { %v578_v29 = vsel %vm572_vm5, %v548_v19, 0.0  ;;  %v1455_v19 = vld [vmem:[%s2368_s2 + $0x28] sm:$0xff] }
 0x177   : > { %v581_v6 = vadd.f32 %v575_v4, %v514_v1  ;;  %v616_v7 = vmul.f32 %v1935_v48, %v580_v2  ;;  %v633_v15 = vsel %vm323_vm0, %v619_v10, 0.0 }
 0x179   : > { %v624_v9 = vsel %vm323_vm0, %v616_v7, 0.0  ;;  %v617_v46 = vmul.f32 %v1957_v59, %v581_v6 }
 0x17a   : > { %625 = vadd.xlane.f32.xlu1 %v624_v9 }
 0x17b   : > { %v627_v11 = vsel %vm323_vm0, %v617_v46, 0.0 }
 0x17c   : > { %628 = vadd.xlane.f32.xlu0 %v627_v11 }
 0x17e   : > { %634 = vadd.xlane.f32.xlu1 %v633_v15 }
 0x180   : > { %631 = vadd.xlane.f32.xlu0 %v630_v16  ;;  %v1454_v16 = vld [vmem:[%s2368_s2 + $0x20] sm:$0xff] }
 0x185   : > { %v2029_v18 = vpop.permute.xlu1 %612 }
 0x189   : > { %v505_v26 = vpop.permute.xlu1 %504 }
 0x18a   : > { %v517_v27 = vadd.f32 %v505_v26, %v487_v24  ;;  %v1568_v24 = vpack.c.bf16 %v1455_v19, %v1454_v16  ;;  %v1456_v26 = vld [vmem:[%s2368_s2 + $0x30] sm:$0xff] }
 0x18c   : > { %v584_v30 = vadd.f32 %v578_v29, %v517_v27  ;;  %v1457_v27 = vld [vmem:[%s2368_s2 + $0x38] sm:$0xff]  ;;  %1569 = vmatprep.subr.bf16.mxu1 %v1568_v24 }
 0x18d   : > { %v1572_v29 = vpack.c.bf16 %v1457_v27, %v1456_v26  ;;  %1571 = vmatpush3.bf16.msra.mxu1 %v1568_v24 }
 0x18e   : > { %v620_v31 = vmul.f32 %v2029_v18, %v584_v30 }
 0x18f   : > { %1573 = vmatprep.subr.bf16.mxu1 %v1572_v29 }
 0x190   : > { %v636_v32 = vsel %vm323_vm0, %v620_v31, 0.0 }
 0x191   : > { %637 = vadd.xlane.f32.xlu0 %v636_v32  ;;  %1575 = vmatpush3.bf16.msra.mxu1 %v1572_v29 }
 0x1fd   : > { %v623_v3 = vpop.xlane.xlu0 %622 }
 0x1fe   : > { %v640_v33 = vmul.f32 0.03125, %v623_v3 }
 0x200   : > { %v2044_v5 = vsub.f32 %v615_v21, %v640_v33 }
 0x202   : > { %v652_v40 = vmul.f32 %v2044_v5, %v2044_v5 }
 0x204   : > { %v658_v23 = vsel %vm323_vm0, %v652_v40, 0.0 }
 0x205   : > { %659 = vadd.xlane.f32.xlu1 %v658_v23  ;;  %v1452_v23 = vld [vmem:[%s2369_s3] ss:$0 sm:$0xff] }
 0x207   : > { %v626_v34 = vpop.xlane.xlu1 %625 }
 0x208   : > { %v641_v35 = vmul.f32 0.03125, %v626_v34 }
 0x209   : > { %v629_v36 = vpop.xlane.xlu0 %628 }
 0x20a   : > { %v2049_v37 = vsub.f32 %v616_v7, %v641_v35  ;;  %v642_v39 = vmul.f32 0.03125, %v629_v36 }
 0x20b   : > { %v635_v41 = vpop.xlane.xlu1 %634 }
 0x20c   : > { %v2051_v42 = vsub.f32 %v617_v46, %v642_v39  ;;  %v644_v43 = vmul.f32 0.03125, %v635_v41  ;;  %v653_v21 = vmul.f32 %v2049_v37, %v2049_v37 }
 0x20d   : > { %v632_v38 = vpop.xlane.xlu0 %631 }
 0x20e   : > { %v2055_v44 = vsub.f32 %v619_v10, %v644_v43  ;;  %v643_v45 = vmul.f32 0.03125, %v632_v38  ;;  %v661_v0 = vsel %vm323_vm0, %v653_v21, 0.0  ;;  %v654_v1 = vmul.f32 %v2051_v42, %v2051_v42 }
 0x20f   : > { %662 = vadd.xlane.f32.xlu0 %v661_v0  ;;  %v1453_v0 = vld [vmem:[%s2370_s4] ss:$0 sm:$0xff] }
 0x210   : > { %v2060_v2 = vsub.f32 %v618_v12, %v643_v45  ;;  %v664_v4 = vsel %vm323_vm0, %v654_v1, 0.0  ;;  %v656_v6 = vmul.f32 %v2055_v44, %v2055_v44 }
 0x211   : > { %665 = vadd.xlane.f32.xlu1 %v664_v4 }
 0x212   : > { %v655_v7 = vmul.f32 %v2060_v2, %v2060_v2  ;;  %v670_v8 = vsel %vm323_vm0, %v656_v6, 0.0 }
 0x214   : > { %v667_v9 = vsel %vm323_vm0, %v655_v7, 0.0 }
 0x215   : > { %671 = vadd.xlane.f32.xlu1 %v670_v8  ;;  %668 = vadd.xlane.f32.xlu0 %v667_v9 }
 0x21e   : > { %v638_v46 = vpop.xlane.xlu0 %637 }
 0x21f   : > { %v645_v10 = vmul.f32 0.03125, %v638_v46 }
 0x221   : > { %v2069_v11 = vsub.f32 %v620_v31, %v645_v10 }
 0x223   : > { %v657_v12 = vmul.f32 %v2069_v11, %v2069_v11 }
 0x225   : > { %v673_v15 = vsel %vm323_vm0, %v657_v12, 0.0 }
 0x226   : > { %674 = vadd.xlane.f32.xlu0 %v673_v15 }
 0x292   : > { %v660_v30 = vpop.xlane.xlu1 %659 }
 0x293   : > { %v676_v31 = vmul.f32 0.03125, %v660_v30 }
 0x295   : > { %v682_v32 = vadd.f32 1e-05, %v676_v31 }
 0x297   : > { %1647 = vrsqrt.f32 %v682_v32 }
 0x29c   : > { %v663_v3 = vpop.xlane.xlu0 %662 }
 0x29d   : > { %v677_v33 = vmul.f32 0.03125, %v663_v3 }
 0x29e   : > { %v666_v40 = vpop.xlane.xlu1 %665 }
 0x29f   : > { %v683_v34 = vadd.f32 1e-05, %v677_v33  ;;  %v678_v35 = vmul.f32 0.03125, %v666_v40 }
 0x2a1   : > { %v1648_v36 = vpop.eup %1647  ;;  %1649 = vrsqrt.f32 %v683_v34  ;;  %v684_v39 = vadd.f32 1e-05, %v678_v35 }
 0x2a2   : > { %v672_v41 = vpop.xlane.xlu1 %671  ;;  %v669_v43 = vpop.xlane.xlu0 %668  ;;  %v701_v21 = vmul.f32 %v1648_v36, %v1452_v23 }
 0x2a3   : > { %1651 = vrsqrt.f32 %v684_v39  ;;  %v680_v38 = vmul.f32 0.03125, %v672_v41  ;;  %v679_v45 = vmul.f32 0.03125, %v669_v43 }
 0x2a4   : > { %v707_v1 = vmul.f32 %v701_v21, %v2044_v5 }
 0x2a5   : > { %v686_v4 = vadd.f32 1e-05, %v680_v38  ;;  %v685_v6 = vadd.f32 1e-05, %v679_v45 }
 0x2a6   : > { %v720_v7 = vadd.f32 %v1453_v0, %v707_v1 }
 0x2a7   : > { %1653 = vrsqrt.f32 %v686_v4 }
 0x2a8   : > { %1655 = vrsqrt.f32 %v685_v6  ;;  %v726_v8 = vmax.f32 %v720_v7, 0.0 }
 0x2aa   : > { %1534 = vmatprep.mubr.msk.f32.mxu1 %vm323_vm0, %v726_v8 }
 0x2ab   : > { %v1650_v9 = vpop.eup %1649 }
 0x2ac   : > { %v702_v46 = vmul.f32 %v1650_v9, %v1452_v23 }
 0x2ad   : > { %v1652_v10 = vpop.eup %1651 }
 0x2ae   : > { %v708_v12 = vmul.f32 %v702_v46, %v2049_v37  ;;  %v703_v15 = vmul.f32 %v1652_v10, %v1452_v23 }
 0x2b0   : > { %v721_v16 = vadd.f32 %v1453_v0, %v708_v12  ;;  %v709_v19 = vmul.f32 %v703_v15, %v2051_v42 }
 0x2b1   : > { %v1654_v24 = vpop.eup %1653 }
 0x2b2   : > { %v1656_v26 = vpop.eup %1655  ;;  %v727_v5 = vmax.f32 %v721_v16, 0.0  ;;  %v722_v27 = vadd.f32 %v1453_v0, %v709_v19  ;;  %v705_v29 = vmul.f32 %v1654_v24, %v1452_v23 }
 0x2b3   : > { %v675_v30 = vpop.xlane.xlu0 %674  ;;  %v704_v31 = vmul.f32 %v1656_v26, %v1452_v23 }
 0x2b4   : > { %v681_v32 = vmul.f32 0.03125, %v675_v30  ;;  %1535 = vmatmul.mubr.msk.f32.vlgmr.msra.gmra.mrb[2].mxu1 %vm323_vm0, %v727_v5  ;;  %v728_v3 = vmax.f32 %v722_v27, 0.0  ;;  %v711_v33 = vmul.f32 %v705_v29, %v2055_v44 }
 0x2b5   : > { %v710_v40 = vmul.f32 %v704_v31, %v2060_v2 }
 0x2b6   : > { %v687_v37 = vadd.f32 1e-05, %v681_v32  ;;  %1537 = vmatprep.mubr.msk.f32.mxu1 %vm323_vm0, %v728_v3  ;;  %v724_v34 = vadd.f32 %v1453_v0, %v711_v33 }
 0x2b7   : > { %v723_v42 = vadd.f32 %v1453_v0, %v710_v40 }
 0x2b8   : > { %1657 = vrsqrt.f32 %v687_v37  ;;  %v730_v35 = vmax.f32 %v724_v34, 0.0 }
 0x2b9   : > { %v729_v36 = vmax.f32 %v723_v42, 0.0 }
 0x2bb   : > { %1538 = vmatmul.mubr.msk.f32.gmra.mrb[4].mxu1 %vm323_vm0, %v729_v36 }
 0x2bc   : > { %1540 = vmatprep.mubr.msk.f32.mxu1 %vm323_vm0, %v730_v35 }
 0x2c2   : > { %v1658_v39 = vpop.eup %1657 }
 0x2c3   : > { %v706_v41 = vmul.f32 %v1658_v39, %v1452_v23 }
 0x2c5   : > { %v712_v43 = vmul.f32 %v706_v41, %v2069_v11 }
 0x2c7   : > { %v725_v21 = vadd.f32 %v1453_v0, %v712_v43 }
 0x2c9   : > { %v731_v44 = vmax.f32 %v725_v21, 0.0 }
 0x2cb   : > { %1541 = vmatmul.mubr.msk.f32.gmra.mrb[6].mxu1 %vm323_vm0, %v731_v44 }
 0x387   : > { %v1536_v2 = vpop.f32.mrb[2].mxu1 }
 0x388   : > { %v851_v38 = vrot.slane %v1536_v2, 7  ;;  %900 = vrot.lane.b32.xlu0 %v1536_v2, %s1739_s16  ;;  %v821_v45 = vpop.f32.mrb[3].mxu1 }
 0x389   : > { %v850_v1 = vrot.slane %v821_v45, 7  ;;  %898 = vrot.lane.b32.xlu1 %v821_v45, %s1739_s16 }
 0x38b   : > { %v860_v4 = vsel %vm445_vm7, %v850_v1, %v851_v38 }
 0x38c   : > { %876 = vrot.lane.b32.xlu0 %v1536_v2, %s1738_s15  ;;  %v863_v41 = vsel %vm477_vm12, %v860_v4, 0.0 }
 0x38d   : > { %874 = vrot.lane.b32.xlu1 %v821_v45, %s1738_s15 }
 0x38e   : > { %v1539_v11 = vpop.f32.mrb[4].mxu1 }
 0x38f   : > { %v853_v23 = vrot.slane %v1539_v11, 7  ;;  %v831_v0 = vpop.f32.mrb[5].mxu1 }
 0x390   : > { %v852_v6 = vrot.slane %v831_v0, 7 }
 0x391   : > { %904 = vrot.lane.b32.xlu1 %v1539_v11, %s1739_s16 }
 0x392   : > { %v859_v7 = vsel %vm445_vm7, %v851_v38, %v852_v6  ;;  %v858_v8 = vsel %vm445_vm7, %v852_v6, %v853_v23 }
 0x393   : > { %v864_v38 = vsel %vm478_vm15, %v859_v7, 0.0 }
 0x395   : > { %902 = vrot.lane.b32.xlu1 %v831_v0, %s1739_s16 }
 0x399   : > { %878 = vrot.lane.b32.xlu1 %v831_v0, %s1738_s15 }
 0x39e   : > { %v1542_v9 = vpop.f32.mrb[6].mxu1 }
 0x39f   : > { %v855_v46 = vrot.slane %v1542_v9, 7  ;;  %908 = vrot.lane.b32.xlu1 %v1542_v9, %s1739_s16  ;;  %v841_v10 = vpop.f32.mrb[7].mxu1 }
 0x3a0   : > { %v854_v12 = vrot.slane %v841_v10, 7  ;;  %906 = vrot.lane.b32.xlu0 %v841_v10, %s1739_s16 }
 0x3a1   : > { %v861_v15 = vsel %vm445_vm7, %v855_v46, %v850_v1 }
 0x3a2   : > { %v856_v16 = vsel %vm445_vm7, %v854_v12, %v855_v46  ;;  %v857_v19 = vsel %vm445_vm7, %v853_v23, %v854_v12  ;;  %v862_v31 = vsel %vm476_vm9, %v861_v15, 0.0 }
 0x3a3   : > { %884 = vrot.lane.b32.xlu1 %v1542_v9, %s1738_s15 }
 0x3a4   : > { %880 = vrot.lane.b32.xlu0 %v1539_v11, %s1738_s15 }
 0x3a8   : > { %882 = vrot.lane.b32.xlu0 %v841_v10, %s1738_s15 }
 0x3fa   : > { %v901_v24 = vpop.permute.xlu0 %900 }
 0x3fb   : > { %v917_v26 = vrot.slane %v901_v24, 1  ;;  %v899_v5 = vpop.permute.xlu1 %898 }
 0x3fc   : > { %v916_v27 = vrot.slane %v899_v5, 1  ;;  %v867_v5 = vsel %vm481_vm4, %v856_v16, 0.0 }
 0x3fe   : > { %v926_v29 = vsel %vm542_vm8, %v916_v27, %v917_v26  ;;  %v877_v42 = vpop.permute.xlu0 %876 }
 0x3ff   : > { %v875_v30 = vpop.permute.xlu1 %874  ;;  %v928_v3 = vsel %vm567_vm10, %v926_v29, 0.0  ;;  %v893_v43 = vadd.f32 %v877_v42, %v863_v41  ;;  %v866_v42 = vsel %vm480_vm11, %v857_v19, 0.0 }
 0x400   : > { %v892_v32 = vadd.f32 %v875_v30, %v862_v31  ;;  %v865_v31 = vsel %vm479_vm14, %v858_v8, 0.0 }
 0x402   : > { %v934_v33 = vadd.f32 %v928_v3, %v892_v32 }
 0x403   : > { %v905_v40 = vpop.permute.xlu1 %904 }
 0x404   : > { %v940_v37 = vmul.f32 %v934_v33, %v1945_v53  ;;  %v919_v36 = vrot.slane %v905_v40, 1 }
 0x406   : > { %v946_v34 = vsel %vm323_vm0, %v940_v37, 0.0 }
 0x407   : > { %v903_v35 = vpop.permute.xlu1 %902  ;;  %947 = vadd.xlane.f32.xlu0 %v946_v34 }
 0x408   : > { %v918_v39 = vrot.slane %v903_v35, 1 }
 0x40a   : > { %v925_v21 = vsel %vm542_vm8, %v917_v26, %v918_v39  ;;  %v924_v44 = vsel %vm542_vm8, %v918_v39, %v919_v36 }
 0x40b   : > { %v879_v2 = vpop.permute.xlu1 %878  ;;  %v929_v45 = vsel %vm568_vm13, %v925_v21, 0.0  ;;  %v930_v23 = vsel %vm569_vm2, %v924_v44, 0.0 }
 0x40c   : > { %v894_v1 = vadd.f32 %v879_v2, %v864_v38  ;;  %v935_v11 = vadd.f32 %v929_v45, %v893_v43 }
 0x40e   : > { %v936_v4 = vadd.f32 %v930_v23, %v894_v1  ;;  %v941_v0 = vmul.f32 %v935_v11, %v1935_v48 }
 0x410   : > { %v949_v6 = vsel %vm323_vm0, %v941_v0, 0.0  ;;  %v942_v9 = vmul.f32 %v936_v4, %v1957_v59 }
 0x411   : > { %v909_v46 = vpop.permute.xlu1 %908  ;;  %950 = vadd.xlane.f32.xlu1 %v949_v6 }
 0x412   : > { %v921_v10 = vrot.slane %v909_v46, 1  ;;  %v907_v12 = vpop.permute.xlu0 %906  ;;  %v952_v7 = vsel %vm323_vm0, %v942_v9, 0.0 }
 0x413   : > { %v920_v15 = vrot.slane %v907_v12, 1  ;;  %953 = vadd.xlane.f32.xlu0 %v952_v7 }
 0x414   : > { %v927_v24 = vsel %vm542_vm8, %v921_v10, %v916_v27 }
 0x415   : > { %v885_v26 = vpop.permute.xlu1 %884  ;;  %v923_v29 = vsel %vm542_vm8, %v919_v36, %v920_v15  ;;  %v933_v33 = vsel %vm572_vm5, %v927_v24, 0.0  ;;  %v922_v16 = vsel %vm542_vm8, %v920_v15, %v921_v10 }
 0x416   : > { %v897_v30 = vadd.f32 %v885_v26, %v867_v5  ;;  %v881_v32 = vpop.permute.xlu0 %880  ;;  %v931_v40 = vsel %vm570_vm1, %v923_v29, 0.0  ;;  %v932_v39 = vsel %vm571_vm3, %v922_v16, 0.0 }
 0x417   : > { %v895_v3 = vadd.f32 %v881_v32, %v865_v31 }
 0x418   : > { %v939_v27 = vadd.f32 %v933_v33, %v897_v30 }
 0x419   : > { %v937_v34 = vadd.f32 %v931_v40, %v895_v3 }
 0x41a   : > { %v883_v35 = vpop.permute.xlu0 %882  ;;  %v945_v21 = vmul.f32 %v939_v27, %v2029_v18 }
 0x41b   : > { %v896_v36 = vadd.f32 %v883_v35, %v866_v42  ;;  %v943_v8 = vmul.f32 %v937_v34, %v1961_v61 }
 0x41c   : > { %v961_v2 = vsel %vm323_vm0, %v945_v21, 0.0 }
 0x41d   : > { %v938_v41 = vadd.f32 %v932_v39, %v896_v36  ;;  %v955_v43 = vsel %vm323_vm0, %v943_v8, 0.0  ;;  %v1058_v36 = vld [vmem:[%s2371_s5] sm:$0xff] }
 0x41e   : > { %956 = vadd.xlane.f32.xlu0 %v955_v43  ;;  %v1061_v43 = vld [vmem:[%s2371_s5 + $0x18] sm:$0xff] }
 0x41f   : > { %v944_v44 = vmul.f32 %v938_v41, %v1965_v63  ;;  %v1060_v41 = vld [vmem:[%s2371_s5 + $0x10] sm:$0xff] }
 0x421   : > { %v958_v38 = vsel %vm323_vm0, %v944_v44, 0.0 }
 0x422   : > { %962 = vadd.xlane.f32.xlu0 %v961_v2  ;;  %959 = vadd.xlane.f32.xlu1 %v958_v38 }
 0x494   : > { %v948_v19 = vpop.xlane.xlu0 %947 }
 0x495   : > { %v964_v45 = vmul.f32 0.03125, %v948_v19 }
 0x497   : > { %v2176_v1 = vsub.f32 %v940_v37, %v964_v45 }
 0x499   : > { %v976_v11 = vmul.f32 %v2176_v1, %v2176_v1 }
 0x49b   : > { %v982_v23 = vsel %vm323_vm0, %v976_v11, 0.0 }
 0x49c   : > { %983 = vadd.xlane.f32.xlu1 %v982_v23 }
 0x49e   : > { %v951_v4 = vpop.xlane.xlu1 %950 }
 0x49f   : > { %v965_v6 = vmul.f32 0.03125, %v951_v4  ;;  %v1465_v4 = vld [vmem:[%s2369_s3 + $0x1] ss:$0 sm:$0xff] }
 0x4a0   : > { %v954_v46 = vpop.xlane.xlu0 %953 }
 0x4a1   : > { %v2181_v10 = vsub.f32 %v941_v0, %v965_v6  ;;  %v966_v12 = vmul.f32 0.03125, %v954_v46 }
 0x4a3   : > { %v2183_v7 = vsub.f32 %v942_v9, %v966_v12  ;;  %v977_v15 = vmul.f32 %v2181_v10, %v2181_v10 }
 0x4a5   : > { %v985_v37 = vsel %vm323_vm0, %v977_v15, 0.0  ;;  %v978_v24 = vmul.f32 %v2183_v7, %v2183_v7 }
 0x4a6   : > { %986 = vadd.xlane.f32.xlu0 %v985_v37 }
 0x4a7   : > { %v988_v26 = vsel %vm323_vm0, %v978_v24, 0.0 }
 0x4a8   : > { %989 = vadd.xlane.f32.xlu1 %v988_v26 }
 0x4ab   : > { %v957_v5 = vpop.xlane.xlu0 %956 }
 0x4ac   : > { %v967_v29 = vmul.f32 0.03125, %v957_v5 }
 0x4ae   : > { %v2191_v30 = vsub.f32 %v943_v8, %v967_v29  ;;  %v1059_v8 = vld [vmem:[%s2371_s5 + $0x8] sm:$0xff] }
 0x4af   : > { %v960_v0 = vpop.xlane.xlu1 %959  ;;  %v963_v31 = vpop.xlane.xlu0 %962  ;;  %v1576_v39 = vpack.c.bf16 %v1059_v8, %v1058_v36 }
 0x4b0   : > { %v968_v9 = vmul.f32 0.03125, %v960_v0  ;;  %v969_v32 = vmul.f32 0.03125, %v963_v31  ;;  %v979_v3 = vmul.f32 %v2191_v30, %v2191_v30 }
 0x4b1   : > { %1577 = vmatprep.subr.bf16.mxu0 %v1576_v39 }
 0x4b2   : > { %v2195_v33 = vsub.f32 %v944_v44, %v968_v9  ;;  %v2197_v40 = vsub.f32 %v945_v21, %v969_v32  ;;  %v991_v27 = vsel %vm323_vm0, %v979_v3, 0.0  ;;  %1579 = vmatpush3.bf16.msra.mxu0 %v1576_v39  ;;  %v1580_v21 = vpack.c.bf16 %v1061_v43, %v1060_v41 }
 0x4b3   : > { %992 = vadd.xlane.f32.xlu0 %v991_v27  ;;  %v1740_v44 = vmov 3  }
 0x4b4   : > { %v980_v34 = vmul.f32 %v2195_v33, %v2195_v33  ;;  %v981_v16 = vmul.f32 %v2197_v40, %v2197_v40  ;;  %1581 = vmatprep.subr.bf16.mxu0 %v1580_v21  ;;  %1645 = vset.pattern.permute.xlu0 %v1740_v44 }
 0x4b5   : > { %1646 = vset.pattern.permute.xlu1 %v1740_v44 }
 0x4b6   : > { %v994_v42 = vsel %vm323_vm0, %v980_v34, 0.0  ;;  %v997_v35 = vsel %vm323_vm0, %v981_v16, 0.0  ;;  %1583 = vmatpush3.bf16.msra.mxu0 %v1580_v21 }
 0x4b7   : > { %995 = vadd.xlane.f32.xlu1 %v994_v42  ;;  %998 = vadd.xlane.f32.xlu0 %v997_v35 }
 0x4c8   : > { %1293 = vperm.xlu1 %1646, %v1876_v20  }
 0x4cd   : > { %1285 = vperm.xlu0 %1645, %v1857_v13  }
 0x4d1   : > { %1289 = vperm.xlu0 %1645, %v1860_v14   ;;  %v1467_v14 = vld [vmem:[%s2370_s4 + $0x1] ss:$0 sm:$0xff] }
 0x4d5   : > { %1297 = vperm.xlu0 %1645, %v1870_v17  }
 0x529   : > { %v984_v2 = vpop.xlane.xlu1 %983 }
 0x52a   : > { %v1000_v38 = vmul.f32 0.03125, %v984_v2 }
 0x52c   : > { %v1006_v19 = vadd.f32 1e-05, %v1000_v38 }
 0x52e   : > { %1659 = vrsqrt.f32 %v1006_v19 }
 0x533   : > { %v987_v45 = vpop.xlane.xlu0 %986 }
 0x534   : > { %v1001_v11 = vmul.f32 0.03125, %v987_v45 }
 0x535   : > { %v990_v23 = vpop.xlane.xlu1 %989 }
 0x536   : > { %v1007_v6 = vadd.f32 1e-05, %v1001_v11  ;;  %v1002_v46 = vmul.f32 0.03125, %v990_v23 }
 0x538   : > { %v1660_v13 = vpop.eup %1659  ;;  %1661 = vrsqrt.f32 %v1007_v6  ;;  %v1008_v20 = vadd.f32 1e-05, %v1002_v46 }
 0x539   : > { %v1026_v12 = vmul.f32 %v1660_v13, %v1465_v4 }
 0x53a   : > { %1663 = vrsqrt.f32 %v1008_v20 }
 0x53b   : > { %v1032_v17 = vmul.f32 %v1026_v12, %v2176_v1 }
 0x53d   : > { %v1046_v15 = vadd.f32 %v1467_v14, %v1032_v17 }
 0x53f   : > { %v1052_v37 = vmax.f32 %v1046_v15, 0.0 }
 0x540   : > { %v993_v24 = vpop.xlane.xlu0 %992 }
 0x541   : > { %v1003_v26 = vmul.f32 0.03125, %v993_v24  ;;  %1551 = vmatprep.mubr.msk.f32.mxu0 %vm323_vm0, %v1052_v37 }
 0x542   : > { %v1662_v5 = vpop.eup %1661 }
 0x543   : > { %v1027_v29 = vmul.f32 %v1662_v5, %v1465_v4  ;;  %v1009_v0 = vadd.f32 1e-05, %v1003_v26 }
 0x544   : > { %v1664_v31 = vpop.eup %1663  ;;  %v996_v9 = vpop.xlane.xlu1 %995 }
 0x545   : > { %v999_v32 = vpop.xlane.xlu0 %998  ;;  %v1033_v3 = vmul.f32 %v1027_v29, %v2181_v10  ;;  %1665 = vrsqrt.f32 %v1009_v0  ;;  %v1004_v27 = vmul.f32 0.03125, %v996_v9  ;;  %v1028_v16 = vmul.f32 %v1664_v31, %v1465_v4 }
 0x546   : > { %v1005_v34 = vmul.f32 0.03125, %v999_v32 }
 0x547   : > { %v1047_v42 = vadd.f32 %v1467_v14, %v1033_v3  ;;  %v1010_v1 = vadd.f32 1e-05, %v1004_v27  ;;  %v1034_v36 = vmul.f32 %v1028_v16, %v2183_v7 }
 0x548   : > { %v1011_v35 = vadd.f32 1e-05, %v1005_v34  ;;  %v1294_v16 = vpop.permute.xlu1 %1293 }
 0x549   : > { %v1053_v8 = vmax.f32 %v1047_v42, 0.0  ;;  %1667 = vrsqrt.f32 %v1010_v1  ;;  %v1048_v39 = vadd.f32 %v1467_v14, %v1034_v36 }
 0x54a   : > { %1669 = vrsqrt.f32 %v1011_v35 }
 0x54b   : > { %1552 = vmatmul.mubr.msk.f32.vlgmr.msra.gmra.mrb[4].mxu0 %vm323_vm0, %v1053_v8  ;;  %v1054_v41 = vmax.f32 %v1048_v39, 0.0 }
 0x54c   : > { %v1286_v27 = vpop.permute.xlu0 %1285 }
 0x54d   : > { %1554 = vmatprep.mubr.msk.f32.mxu0 %vm323_vm0, %v1054_v41 }
 0x54f   : > { %v1666_v43 = vpop.eup %1665 }
 0x550   : > { %v1029_v10 = vmul.f32 %v1666_v43, %v1465_v4  ;;  %v1290_v34 = vpop.permute.xlu0 %1289 }
 0x552   : > { %v1035_v21 = vmul.f32 %v1029_v10, %v2191_v30  ;;  %v2271_v10 = vld [vmem:[%s2372_s6] ss:$0 sm:$0xff] }
 0x553   : > { %v1668_v44 = vpop.eup %1667 }
 0x554   : > { %v1670_v2 = vpop.eup %1669  ;;  %v1049_v38 = vadd.f32 %v1467_v14, %v1035_v21  ;;  %v1030_v19 = vmul.f32 %v1668_v44, %v1465_v4  ;;  %v2262_v42 = vpop.permute.xlu0 %1297 }
 0x555   : > { %v1031_v45 = vmul.f32 %v1670_v2, %v1465_v4 }
 0x556   : > { %v1055_v11 = vmax.f32 %v1049_v38, 0.0  ;;  %v1036_v7 = vmul.f32 %v1030_v19, %v2195_v33 }
 0x557   : > { %v1037_v23 = vmul.f32 %v1031_v45, %v2197_v40 }
 0x558   : > { %1555 = vmatmul.mubr.msk.f32.gmra.mrb[6].mxu0 %vm323_vm0, %v1055_v11  ;;  %v1050_v6 = vadd.f32 %v1467_v14, %v1036_v7 }
 0x559   : > { %v1051_v46 = vadd.f32 %v1467_v14, %v1037_v23 }
 0x55a   : > { %v1056_v13 = vmax.f32 %v1050_v6, 0.0 }
 0x55b   : > { %v1057_v20 = vmax.f32 %v1051_v46, 0.0 }
 0x55c   : > { %1557 = vmatprep.mubr.msk.f32.mxu0 %vm323_vm0, %v1056_v13 }
 0x55d   : > { %1558 = vmatmul.mubr.msk.f32.gmra.mrb[8].mxu0 %vm323_vm0, %v1057_v20  ;;  %vm1352_vm0 = vcmask 386048  }
 0x61e   : > { %v1553_v30 = vpop.f32.mrb[4].mxu0 }
 0x61f   : > { %v1176_v12 = vrot.slane %v1553_v30, 7  ;;  %1201 = vrot.lane.b32.xlu1 %v1553_v30, %s1741_s13  ;;  %1225 = vrot.lane.b32.xlu0 %v1553_v30, %s1742_s14  ;;  %v1146_v33 = vpop.f32.mrb[5].mxu0 }
 0x620   : > { %v1175_v4 = vrot.slane %v1146_v33, 7 }
 0x622   : > { %v1185_v40 = vsel %vm445_vm7, %v1175_v4, %v1176_v12 }
 0x623   : > { %1223 = vrot.lane.b32.xlu1 %v1146_v33, %s1742_s14  ;;  %v1188_v6 = vsel %vm477_vm12, %v1185_v40, 0.0 }
 0x627   : > { %1199 = vrot.lane.b32.xlu1 %v1146_v33, %s1741_s13 }
 0x62b   : > { %v1556_v14 = vpop.f32.mrb[6].mxu0 }
 0x62c   : > { %v1178_v17 = vrot.slane %v1556_v14, 7  ;;  %1205 = vrot.lane.b32.xlu0 %v1556_v14, %s1741_s13  ;;  %1229 = vrot.lane.b32.xlu1 %v1556_v14, %s1742_s14  ;;  %v1156_v15 = vpop.f32.mrb[7].mxu0 }
 0x62d   : > { %v1177_v37 = vrot.slane %v1156_v15, 7 }
 0x62f   : > { %v1183_v24 = vsel %vm445_vm7, %v1177_v37, %v1178_v17  ;;  %v1184_v26 = vsel %vm445_vm7, %v1176_v12, %v1177_v37 }
 0x630   : > { %1227 = vrot.lane.b32.xlu1 %v1156_v15, %s1742_s14  ;;  %v1559_v5 = vpop.f32.mrb[8].mxu0  ;;  %v1189_v52 = vsel %vm478_vm15, %v1184_v26, 0.0 }
 0x631   : > { %v1180_v29 = vrot.slane %v1559_v5, 7  ;;  %v1166_v0 = vpop.f32.mrb[9].mxu0 }
 0x632   : > { %v1179_v31 = vrot.slane %v1166_v0, 7  ;;  %1231 = vrot.lane.b32.xlu0 %v1166_v0, %s1742_s14 }
 0x633   : > { %v1186_v9 = vsel %vm445_vm7, %v1180_v29, %v1175_v4 }
 0x634   : > { %1203 = vrot.lane.b32.xlu1 %v1156_v15, %s1741_s13  ;;  %v1182_v32 = vsel %vm445_vm7, %v1178_v17, %v1179_v31  ;;  %v2256_v3 = vsel %vm445_vm7, %v1179_v31, %v1180_v29 }
 0x636   : > { %1301 = vperm.xlu0 %1645, %v1889_v25  }
 0x638   : > { %1233 = vrot.lane.b32.xlu1 %v1559_v5, %s1742_s14 }
 0x63a   : > { %1305 = vperm.xlu0 %1645, %v1881_v22   ;;  %v1187_v22 = vsel %vm476_vm9, %v1186_v9, 0.0 }
 0x63c   : > { %1207 = vrot.lane.b32.xlu1 %v1166_v0, %s1741_s13 }
 0x640   : > { %1209 = vrot.lane.b32.xlu1 %v1559_v5, %s1741_s13  ;;  %s1675_s13 = sshll.u32 %s1743_s28, 4  ;;  %s1676_s13 = int_to_ptr.vmem [resolvable:$false] %s1675_s13 }
 0x641   : > { %s1677_s14 = scalar_lea.vmem %s1676_s13, 64  ;;  %p1678_p0 = scmp.lt.s32.totalorder %s2326_s21, %s1676_s13 }
 0x642   : > { %p1679_p1 = scmp.lt.s32.totalorder %s1677_s14, %s1671_s9 }
 0x644   : > { %p1680_p2 = por %p1679_p1, %p1678_p0 }
 0x646   : > { %p1681_p3 = pnand %p1680_p2, %p1674_p13 }
 0x691   : > { %v1202_v1 = vpop.permute.xlu1 %1201  ;;  %v1226_v35 = vpop.permute.xlu0 %1225 }
 0x692   : > { %v1242_v8 = vrot.slane %v1226_v35, 1  ;;  %v1218_v20 = vadd.f32 %v1202_v1, %v1188_v6  ;;  %v1191_v1 = vsel %vm480_vm11, %v1182_v32, 0.0 }
 0x695   : > { %v1224_v36 = vpop.permute.xlu1 %1223 }
 0x696   : > { %v1241_v39 = vrot.slane %v1224_v36, 1 }
 0x698   : > { %v1251_v25 = vsel %vm542_vm8, %v1241_v39, %v1242_v8 }
 0x699   : > { %v1200_v41 = vpop.permute.xlu1 %1199  ;;  %v1253_v21 = vsel %vm567_vm10, %v1251_v25, 0.0 }
 0x69a   : > { %v1217_v43 = vadd.f32 %v1200_v41, %v1187_v22 }
 0x69c   : > { %v1259_v44 = vadd.f32 %v1253_v21, %v1217_v43 }
 0x69e   : > { %v1272_v2 = vadd.f32 %v2271_v10, %v1259_v44  ;;  %v1230_v38 = vpop.permute.xlu1 %1229  ;;  %v1206_v19 = vpop.permute.xlu0 %1205 }
 0x69f   : > { %v1244_v50 = vrot.slane %v1230_v38, 1 }
 0x6a0   : > { %v1278_v45 = vmul.f32 %v1272_v2, %v1945_v53  ;;  %v1190_v53 = vsel %vm479_vm14, %v1183_v24, 0.0 }
 0x6a1   : > { %v1220_v40 = vadd.f32 %v1206_v19, %v1190_v53 }
 0x6a2   : > { %v1228_v11 = vpop.permute.xlu1 %1227  ;;  %v1308_v7 = vmul.f32 %v1286_v27, %v1278_v45 }
 0x6a3   : > { %v1243_v23 = vrot.slane %v1228_v11, 1 }
 0x6a4   : > { %v1232_v46 = vpop.permute.xlu0 %1231  ;;  %v1314_v13 = vmax.f32 %v1308_v7, 0.0 }
 0x6a5   : > { %v1250_v47 = vsel %vm542_vm8, %v1242_v8, %v1243_v23  ;;  %v1245_v30 = vrot.slane %v1232_v46, 1  ;;  %v1249_v12 = vsel %vm542_vm8, %v1243_v23, %v1244_v50 }
 0x6a6   : > { %v1254_v33 = vsel %vm568_vm13, %v1250_v47, 0.0  ;;  %v1204_v4 = vpop.permute.xlu1 %1203  ;;  %1320 = vxpose.xlu1.b32.start [1/6] (short) (narrow) %v1314_v13, 8  ;;  %v1255_v51 = vsel %vm569_vm2, %v1249_v12, 0.0 }
 0x6a7   : > { %v1260_v14 = vadd.f32 %v1254_v33, %v1218_v20  ;;  %v1248_v17 = vsel %vm542_vm8, %v1244_v50, %v1245_v30  ;;  %v1219_v15 = vadd.f32 %v1204_v4, %v1189_v52 }
 0x6a8   : > { %v1256_v37 = vsel %vm570_vm1, %v1248_v17, 0.0 }
 0x6a9   : > { %v1273_v49 = vadd.f32 %v2271_v10, %v1260_v14  ;;  %v1262_v24 = vadd.f32 %v1256_v37, %v1220_v40  ;;  %v1261_v5 = vadd.f32 %v1255_v51, %v1219_v15 }
 0x6aa   : > { %v1234_v29 = vpop.permute.xlu1 %1233 }
 0x6ab   : > { %v1275_v54 = vadd.f32 %v2271_v10, %v1262_v24  ;;  %v1274_v26 = vadd.f32 %v2271_v10, %v1261_v5  ;;  %v1246_v0 = vrot.slane %v1234_v29, 1  ;;  %v1279_v31 = vmul.f32 %v1273_v49, %v1935_v48 }
 0x6ad   : > { %v1280_v9 = vmul.f32 %v1274_v26, %v1957_v59  ;;  %v1247_v55 = vsel %vm542_vm8, %v1245_v30, %v1246_v0  ;;  %v1309_v27 = vmul.f32 %v1290_v34, %v1279_v31  ;;  %v1281_v25 = vmul.f32 %v1275_v54, %v1961_v61 }
 0x6ae   : > { %v1208_v58 = vpop.permute.xlu1 %1207  ;;  %v1257_v41 = vsel %vm571_vm3, %v1247_v55, 0.0  ;;  %v1252_v48 = vsel %vm542_vm8, %v1246_v0, %v1241_v39  ;;  %v1192_v34 = vsel %vm481_vm4, %v2256_v3, 0.0 }
 0x6af   : > { %v1221_v35 = vadd.f32 %v1208_v58, %v1191_v1  ;;  %v1315_v36 = vmax.f32 %v1309_v27, 0.0  ;;  %v1310_v8 = vmul.f32 %v1294_v16, %v1280_v9  ;;  %v1311_v16 = vmul.f32 %v2262_v42, %v1281_v25 }
 0x6b0   : > { %v1258_v60 = vsel %vm572_vm5, %v1252_v48, 0.0 }
 0x6b1   : > { %v1263_v22 = vadd.f32 %v1257_v41, %v1221_v35  ;;  %1321 = vxpose.xlu1.b32.cont [2/6] (short) (narrow) %v1315_v36, 8  ;;  %v1316_v32 = vmax.f32 %v1310_v8, 0.0  ;;  %v1317_v44 = vmax.f32 %v1311_v16, 0.0 }
 0x6b2   : > { %v1210_v59 = vpop.permute.xlu1 %1209 }
 0x6b3   : > { %v1222_v57 = vadd.f32 %v1210_v59, %v1192_v34  ;;  %v1276_v43 = vadd.f32 %v2271_v10, %v1263_v22 }
 0x6b5   : > { %v1264_v61 = vadd.f32 %v1258_v60, %v1222_v57  ;;  %1322 = vxpose.xlu1.b32.cont [3/6] (short) (narrow) %v1316_v32, 8  ;;  %v1282_v28 = vmul.f32 %v1276_v43, %v1965_v63  ;;  %v1302_v39 = vpop.permute.xlu0 %1301 }
 0x6b7   : > { %v1312_v21 = vmul.f32 %v1302_v39, %v1282_v28  ;;  %v1277_v56 = vadd.f32 %v2271_v10, %v1264_v61 }
 0x6b9   : > { %1323 = vxpose.xlu1.b32.cont [4/6] (short) (narrow) %v1317_v44, 8  ;;  %v1283_v3 = vmul.f32 %v1277_v56, %v2029_v18  ;;  %v1306_v2 = vpop.permute.xlu0 %1305  ;;  %v1318_v38 = vmax.f32 %v1312_v21, 0.0 }
 0x6bb   : > { %v1313_v42 = vmul.f32 %v1306_v2, %v1283_v3 }
 0x6bd   : > { %1324 = vxpose.xlu1.b32.cont [5/6] (short) (narrow) %v1318_v38, 8  ;;  %v1319_v62 = vmax.f32 %v1313_v42, 0.0 }
 0x6c1   : > { %1325 = vxpose.xlu1.b32.end [6/6] (short) (narrow) %v1319_v62, 8 }
 0x72d   : > { %v1336_v63 = vpop.trf.xlu1 }
 0x72e   : > { %1353 = vst.msk [vmem:[%s288_s20] sm:$0x3] %vm1352_vm0, %v1336_v63 }
 0x72f   : > { %1684 = shalt.err (!%p1681_p3)
}
 0x730   : > { %s1685_s15 = scalar_lea.hbm %s2324_s29, 32  ;;  %s1689_s18 = scalar_lea.hbm %s2373_s7, 64 }
 0x731   : > { %p1686_p4 = scmp.ne.s32.totalorder %s2324_s29, %s1685_s15  ;;  %p1690_p9 = scmp.lt.u32.totalorder %s2324_s29, %s2373_s7 }
 0x732   : > { %p1691_p10 = scmp.lt.u32.totalorder %s1689_s18, %s1685_s15  ;;  %p1693_p12 = scmp.lt.u32.totalorder %s1685_s15, %s2324_s29 }
 0x733   : > { %p1687_p7 = pnand %p1686_p4, %p1822_p5 }
 0x734   : > { %p1692_p11 = por %p1691_p10, %p1690_p9 }
 0x735   : > { %p1688_p8 = pneg %p1687_p7 }
 0x736   : > { %p1694_p13 = por %p1693_p12, %p1692_p11 }
 0x738   : > { %p1695_p0 = pnand %p1694_p13, %p1688_p8 }
 0x73a   : > { %1698 = shalt.err (!%p1695_p0)
}
 0x73b   : > { %1588 = dma.vmem_to_hbm [thread:$0]  (%p1822_p5), %s2326_s21, 32, %s2324_s29, %s1355_s8  }
 0x73c PF: > { %p1594_p1 = scmp.ge.s32.totalorder %s1733_s27, 2  ;;  %s1380_s22 = sand.u32 1, %s1721_s24  }
 0x73d   : > { %s1381_s23 = scalar_lea.sflag [#allocation3], %s1380_s22 }
 0x73e   : > { %p1591_p2 = pnand %p1594_p1, %p1826_p6 }
 0x740   : > { %1716 = dma.done.wait (!%p1591_p2), %s1381_s23, 32  }
 0x741   : > { %1718 = vsyncadd (!%p1591_p2), %s1381_s23, 4294967264  ;;  %p17_p3 = scmp.ge.s32.totalorder %s1809_s30, 4   ;;  %s2376_s24 = smov %s1725_s25 }
 0x742   : > { %s2377_s25 = smov %s1729_s26  ;;  %s2378_s26 = smov %s1820_s10 }
 0x743   : > { %s2379_s27 = smov %s1809_s30  ;;  %19 = sbr.rel (!%p17_p3) target bundleno = 3 (0x3), region = 89 }
 0x74a   :  { %1386 = vsyncpa [#allocation3], 1 }
 0x74b   :  { %1388 = vsyncpa [#allocation3 + $0x1], 1 }

// kernel: tpu_custom_call.1
= control target key start
LH: loop header
LB: loop body
LE: loop exit
PB: predicated region body
PF: predicated region fallthrough
CT: control target
= control target key end

     0   :  { %12 = vsyncpa [#allocation3], 0  ;;  %s2366_s0 = inlined_call_operand.vmem [shape: f32[96,32], index: 0, kind: input, shape index: {}]   ;;  %s2367_s1 = inlined_call_operand.vmem [shape: f32[96,4], index: 1, kind: input, shape index: {}]   ;;  %s2368_s2 = inlined_call_operand.vmem [shape: f32[2,32,96], index: 2, kind: input, shape index: {}]   ;;  %s2369_s3 = inlined_call_operand.vmem [shape: f32[2,1,32], index: 3, kind: input, shape index: {}]   ;;  %s2370_s4 = inlined_call_operand.vmem [shape: f32[2,1,32], index: 4, kind: input, shape index: {}]   ;;  %s2371_s5 = inlined_call_operand.vmem [shape: f32[32,6], index: 5, kind: input, shape index: {}]   ;;  %s2372_s6 = inlined_call_operand.vmem [shape: f32[1,2], index: 6, kind: input, shape index: {}]   ;;  %s2373_s7 = inlined_call_operand.hbm [shape: f32[2,2,48], index: 7, kind: output, shape index: {}]  }
   0x1   :  { %14 = vsyncpa [#allocation3 + $0x1], 0  ;;  %s1784_s24 = smov 0   ;;  %s1786_s25 = smov 0  }
   0x2   :  { %s1788_s26 = smov 0   ;;  %s1790_s27 = smov 0  }
   0x3 LB: > { %s1805_s28 = sadd.s32 4294967295, %s1733_s27   ;;  %s1439_s29 = sadd.s32 4294967294, %s1733_s27   ;;  %s1733_s27 = sphi %s1790_s27, %s2379_s27   ;;  %s1729_s26 = sphi %s1788_s26, %s2378_s26   ;;  %s1725_s25 = sphi %s1786_s25, %s2377_s25   ;;  %s1721_s24 = sphi %s1784_s24, %s2376_s24  }
   0x4   : > { %s1809_s30 = sadd.s32 1, %s1733_s27   ;;  %s184_s8 = sadd.s32 1, %s1729_s26 }
   0x5   : > { %s181_s9 = ssub.s32 %s1733_s27, %s1809_s30  ;;  %p194_p0 = scmp.ne.s32.totalorder %s1729_s26, %s1725_s25 }
   0x6   : > { %p182_p1 = scmp.eq.s32.totalorder %s181_s9, 0  ;;  %p195_p2 = scmp.eq.s32.totalorder %s1805_s28, 1 }
   0x7   : > { %p200_p3 = scmp.ne.s32.totalorder %s1725_s25, %s1721_s24  ;;  %p201_p4 = scmp.eq.s32.totalorder %s1439_s29, 1 }
   0x8   : > { %s1820_s10 = scalar_select %p182_p1, %s1729_s26, %s184_s8  }
   0x9   : > { %p1822_p5 = por %p195_p2, %p194_p0  ;;  %p1826_p6 = por %p201_p4, %p200_p3 }
   0xa   : > { %p1442_p7 = scmp.ge.s32.totalorder %s1733_s27, 1  ;;  %p252_p8 = scmp.lt.s32.totalorder %s1733_s27, 3 }
   0xc   : > { %p253_p9 = pnand %p1442_p7, %p252_p8 }
   0xd   : > { %v319_v0 = vld [vmem:[%s2368_s2] sm:$0xff] (!%p253_p9)  ;;  %v320_v1 = vld [vmem:[%s2368_s2 + $0x8] sm:$0xff] (!%p253_p9)  ;;  %v321_v2 = vld [vmem:[%s2368_s2 + $0x10] sm:$0xff] (!%p253_p9)  ;;  %s289_s19 = smul.u32 (!%p253_p9), 6, %s1805_s28  ;;  %v1735_v5 = vmov (!%p253_p9), 2   ;;  %v1736_v7 = vmov (!%p253_p9), 0   ;;  %v443_v27 = vlaneseq (!%p253_p9) }
   0xe   : > { %256 = sbr.rel (%p253_p9) target bundleno = 1852 (0x73c), region = 48  ;;  %v1560_v3 = vpack.c.bf16 (!%p253_p9), %v320_v1, %v319_v0  ;;  %v322_v4 = vld [vmem:[%s2368_s2 + $0x18] sm:$0xff] (!%p253_p9)  ;;  %1636 = vset.pattern.permute.xlu1 (!%p253_p9), %v1735_v5  ;;  %1640 = vset.pattern.permute.xlu0 (!%p253_p9), %v1736_v7  ;;  %vm323_vm0 = vcmask (!%p253_p9), 261120   ;;  %v1737_v19 = vmov (!%p253_p9), 1   ;;  %s1738_s15 = smov (!%p253_p9), 96  }
   0xf   : > { %v1564_v6 = vpack.c.bf16 (!%p253_p9), %v322_v4, %v321_v2  ;;  %p290_p10 = scmp.lt.s32.totalorder (!%p253_p9), %s289_s19, 11  ;;  %v1897_v28 = vshrl.u32 (!%p253_p9), %v443_v27, 7  ;;  %s1739_s16 = smov (!%p253_p9), 64  }
  0x10   : > { %1561 = vmatprep.subr.bf16.mxu0 (!%p253_p9), %v1560_v3  ;;  %1584 = vmatprep.subr.bf16.mxu1 (!%p253_p9), %v1560_v3  ;;  %s1741_s13 = smov (!%p253_p9), 126   ;;  %s286_s17 = sand.u32 (!%p253_p9), 1, %s1725_s25  }
  0x11   : > { %1563 = vmatpush3.bf16.msra.mxu0 (!%p253_p9), %v1560_v3  ;;  %1586 = vmatpush3.bf16.msra.mxu1 (!%p253_p9), %v1560_v3  ;;  %vm445_vm7 = vcmp.lt.s32.totalorder (!%p253_p9), %v1897_v28, 1  ;;  %vm542_vm8 = vcmp.lt.s32.totalorder (!%p253_p9), %v1897_v28, 7  ;;  %s1443_s18 = sshll.u32 (!%p253_p9), %s286_s17, 1 }
  0x12   : > { %1565 = vmatprep.subr.bf16.mxu0 (!%p253_p9), %v1564_v6  ;;  %1585 = vmatprep.subr.bf16.mxu1 (!%p253_p9), %v1564_v6  ;;  %s288_s20 = scalar_lea.vmem (!%p253_p9), [#allocation2], %s1443_s18 }
  0x13   : > { %s1368_s21 = sshll.u32 (!%p253_p9), %s288_s20, 4  ;;  %s2326_s21 = int_to_ptr.vmem [resolvable:$true] %s1368_s21 }
  0x14   : > { %s1671_s9 = scalar_lea.vmem (!%p253_p9), %s2326_s21, 32 }
  0x15   : > { %s2381_s19 = smov (!%p290_p10, %s289_s19), 11  ;;  %1567 = vmatpush3.bf16.msra.mxu0 %v1564_v6  ;;  %1587 = vmatpush3.bf16.msra.mxu1 %v1564_v6  ;;  %p1672_p11 = scmp.ne.s32.totalorder %s2326_s21, %s1671_s9 }
  0x16   : > { %s1444_s22 = sshll.u32 %s2381_s19, 3  ;;  %s1476_s19 = sshll.u32 %s1805_s28, 5 }
  0x17   : > { %s293_s8 = scalar_lea.vmem %s2366_s0, %s1444_s22  ;;  %s1852_s14 = scalar_lea.vmem %s2367_s1, %s1444_s22 }
  0x18   : > { %v301_v8 = vld [vmem:[%s293_s8] sm:$0xff]  ;;  %v302_v9 = vld [vmem:[%s293_s8 + $0x8] sm:$0xff]  ;;  %v303_v12 = vld [vmem:[%s293_s8 + $0x10] sm:$0xff]  ;;  %s2324_s29 = scalar_lea.hbm %s2373_s7, %s1476_s19  ;;  %p1673_p12 = pnand %p1672_p11, %p1822_p5 }
  0x19   : > { %v305_v10 = vld [vmem:[%s293_s8 + $0x20] sm:$0xff]  ;;  %1517 = vmatprep.mubr.msk.f32.mxu0 %vm323_vm0, %v301_v8  ;;  %v306_v11 = vld [vmem:[%s293_s8 + $0x28] sm:$0xff]  ;;  %v304_v15 = vld [vmem:[%s293_s8 + $0x18] sm:$0xff]  ;;  %s1355_s8 = scalar_lea.sflag [#allocation3], %s286_s17  ;;  %s1743_s28 = smov [#allocation2]  }
  0x1a   : > { %1523 = vmatprep.mubr.msk.f32.mxu1 %vm323_vm0, %v305_v10  ;;  %v1857_v13 = vld [vmem:[%s1852_s14] sm:$0xff]  ;;  %v1860_v14 = vld [vmem:[%s1852_s14 + $0x8] sm:$0xff]  ;;  %1518 = vmatmul.mubr.msk.f32.vlgmr.msra.gmra.mrb[0].mxu0 %vm323_vm0, %v302_v9  ;;  %v1870_v17 = vld [vmem:[%s1852_s14 + $0x18] sm:$0xff]  ;;  %p1674_p13 = pneg %p1673_p12 }
  0x1b   : > { %1524 = vmatmul.mubr.msk.f32.vlgmr.msra.gmra.mrb[0].mxu1 %vm323_vm0, %v306_v11  ;;  %vm313_vm1 = vcmp.gt.f32.partialorder %v1857_v13, 0.5  ;;  %vm314_vm2 = vcmp.gt.f32.partialorder %v1860_v14, 0.5  ;;  %1520 = vmatprep.mubr.msk.f32.mxu0 %vm323_vm0, %v303_v12  ;;  %vm316_vm3 = vcmp.gt.f32.partialorder %v1870_v17, 0.5  ;;  %v1876_v20 = vld [vmem:[%s1852_s14 + $0x10] sm:$0xff]  ;;  %v1881_v22 = vld [vmem:[%s1852_s14 + $0x28] sm:$0xff]  ;;  %v1889_v25 = vld [vmem:[%s1852_s14 + $0x20] sm:$0xff] }
  0x1c   : > { %v452_v16 = vsel %vm313_vm1, 1, %v1736_v7  ;;  %592 = vperm.xlu0 %1640, %v1860_v14   ;;  %v453_v18 = vsel %vm314_vm2, 1, %v1736_v7  ;;  %v455_v21 = vsel %vm316_vm3, 1, %v1736_v7  ;;  %vm315_vm4 = vcmp.gt.f32.partialorder %v1876_v20, 0.5  ;;  %s1742_s14 = smov 124  }
  0x1d   : > { %550 = vperm.xlu1 %1636, %v452_v16   ;;  %v454_v23 = vsel %vm315_vm4, 1, %v1736_v7  ;;  %vm318_vm5 = vcmp.gt.f32.partialorder %v1881_v22, 0.5  ;;  %vm317_vm6 = vcmp.gt.f32.partialorder %v1889_v25, 0.5 }
  0x1e   : > { %1521 = vmatmul.mubr.msk.f32.gmra.mrb[2].mxu0 %vm323_vm0, %v304_v15  ;;  %v457_v24 = vsel %vm318_vm5, 1, %v1736_v7  ;;  %v456_v26 = vsel %vm317_vm6, 1, %v1736_v7 }
  0x20   : > { %1641 = vset.pattern.permute.xlu0 %v1737_v19 }
  0x21   : > { %553 = vperm.xlu1 %1636, %v453_v18   ;;  %459 = vperm.xlu0 %1641, %v452_v16  }
  0x25   : > { %1637 = vset.pattern.permute.xlu1 %v1737_v19  ;;  %462 = vperm.xlu0 %1641, %v453_v18  }
  0x26   : > { %468 = vperm.xlu1 %1637, %v455_v21  }
  0x29   : > { %465 = vperm.xlu0 %1641, %v454_v23  }
  0x2a   : > { %1638 = vset.pattern.permute.xlu1 %v1736_v7 }
  0x2b   : > { %587 = vperm.xlu1 %1638, %v1857_v13  }
  0x2d   : > { %474 = vperm.xlu0 %1641, %v457_v24  }
  0x2f   : > { %1639 = vset.pattern.permute.xlu1 %v1735_v5 }
  0x30   : > { %559 = vperm.xlu1 %1639, %v455_v21  }
  0x31   : > { %1643 = vset.pattern.permute.xlu0 %v1735_v5 }
  0x32   : > { %556 = vperm.xlu0 %1643, %v454_v23  }
  0x34   : > { %1642 = vset.pattern.permute.xlu1 %v1737_v19 }
  0x35   : > { %471 = vperm.xlu1 %1642, %v456_v26  }
  0x36   : > { %562 = vperm.xlu0 %1643, %v456_v26  }
  0x39   : > { %1644 = vset.pattern.permute.xlu1 %v1736_v7 }
  0x3a   : > { %597 = vperm.xlu1 %1644, %v1876_v20   ;;  %565 = vperm.xlu0 %1643, %v457_v24  }
  0x3e   : > { %602 = vperm.xlu1 %1644, %v1870_v17  }
  0x42   : > { %607 = vperm.xlu1 %1644, %v1889_v25  }
  0x9b   : > { %v1935_v48 = vpop.permute.xlu0 %592 }
  0x9c   : > { %v1933_v47 = vpop.permute.xlu1 %550 }
  0x9d   : > { %vm567_vm10 = vcmp.eq.s32.totalorder %v1933_v47, 1 }
  0xa0   : > { %v1937_v49 = vpop.permute.xlu1 %553  ;;  %v1939_v50 = vpop.permute.xlu0 %459 }
  0xa1   : > { %vm476_vm9 = vcmp.eq.s32.totalorder %v1939_v50, 1  ;;  %vm568_vm13 = vcmp.eq.s32.totalorder %v1937_v49, 1 }
  0xa4   : > { %v1943_v52 = vpop.permute.xlu0 %462 }
  0xa5   : > { %v1941_v51 = vpop.permute.xlu1 %468  ;;  %vm477_vm12 = vcmp.eq.s32.totalorder %v1943_v52, 1 }
  0xa6   : > { %vm479_vm14 = vcmp.eq.s32.totalorder %v1941_v51, 1 }
  0xa8   : > { %v1947_v54 = vpop.permute.xlu0 %465 }
  0xa9   : > { %vm478_vm15 = vcmp.eq.s32.totalorder %v1947_v54, 1 }
  0xaa   : > { %v1945_v53 = vpop.permute.xlu1 %587 }
  0xac   : > { %v1951_v56 = vpop.permute.xlu0 %474 }
  0xad   : > { %vm481_vm4 = vcmp.eq.s32.totalorder %v1951_v56, 1 }
  0xaf   : > { %v1949_v55 = vpop.permute.xlu1 %559 }
  0xb0   : > { %vm570_vm1 = vcmp.eq.s32.totalorder %v1949_v55, 1 }
  0xb1   : > { %v1955_v58 = vpop.permute.xlu0 %556 }
  0xb2   : > { %vm569_vm2 = vcmp.eq.s32.totalorder %v1955_v58, 1 }
  0xb4   : > { %v1953_v57 = vpop.permute.xlu1 %471 }
  0xb5   : > { %v1959_v60 = vpop.permute.xlu0 %562  ;;  %vm480_vm11 = vcmp.eq.s32.totalorder %v1953_v57, 1 }
  0xb6   : > { %vm571_vm3 = vcmp.eq.s32.totalorder %v1959_v60, 1 }
  0xb9   : > { %v1957_v59 = vpop.permute.xlu1 %597  ;;  %v1963_v62 = vpop.permute.xlu0 %565 }
  0xba   : > { %vm572_vm5 = vcmp.eq.s32.totalorder %v1963_v62, 1 }
  0xbd   : > { %v1961_v61 = vpop.permute.xlu1 %602 }
  0xc1   : > { %v1965_v63 = vpop.permute.xlu1 %607 }
  0xed   : > { %v1519_v29 = vpop.f32.mrb[0].mxu0 }
  0xee   : > { %v1525_v30 = vpop.f32.mrb[0].mxu1  ;;  %v438_v31 = vrot.slane %v1519_v29, 7  ;;  %496 = vrot.lane.b32.xlu1 %v1519_v29, %s1738_s15  ;;  %520 = vrot.lane.b32.xlu0 %v1519_v29, %s1739_s16  ;;  %v408_v33 = vpop.f32.mrb[1].mxu0 }
  0xef   : > { %v442_v32 = vrot.slane %v1525_v30, 7  ;;  %v428_v34 = vpop.f32.mrb[1].mxu1  ;;  %v437_v35 = vrot.slane %v408_v33, 7 }
  0xf0   : > { %v441_v36 = vrot.slane %v428_v34, 7 }
  0xf1   : > { %v1522_v37 = vpop.f32.mrb[2].mxu0  ;;  %v1904_v38 = vsel %vm445_vm7, %v437_v35, %v438_v31  ;;  %v451_v39 = vsel %vm445_vm7, %v442_v32, %v437_v35 }
  0xf2   : > { %v1910_v40 = vsel %vm445_vm7, %v441_v36, %v442_v32  ;;  %v440_v41 = vrot.slane %v1522_v37, 7  ;;  %528 = vrot.lane.b32.xlu0 %v1525_v30, %s1739_s16  ;;  %518 = vrot.lane.b32.xlu1 %v408_v33, %s1739_s16  ;;  %v418_v42 = vpop.f32.mrb[3].mxu0  ;;  %v482_v9 = vsel %vm476_vm9, %v451_v39, 0.0 }
  0xf3   : > { %v439_v43 = vrot.slane %v418_v42, 7 }
  0xf4   : > { %v447_v44 = vsel %vm445_vm7, %v440_v41, %v441_v36 }
  0xf5   : > { %v1918_v45 = vsel %vm445_vm7, %v439_v43, %v440_v41  ;;  %v1922_v46 = vsel %vm445_vm7, %v438_v31, %v439_v43  ;;  %v486_v27 = vsel %vm480_vm11, %v447_v44, 0.0 }
  0xf6   : > { %526 = vrot.lane.b32.xlu0 %v428_v34, %s1739_s16  ;;  %494 = vrot.lane.b32.xlu1 %v408_v33, %s1738_s15  ;;  %v485_v36 = vsel %vm479_vm14, %v1918_v45, 0.0  ;;  %v484_v43 = vsel %vm478_vm15, %v1922_v46, 0.0 }
  0xfa   : > { %500 = vrot.lane.b32.xlu0 %v1522_v37, %s1738_s15  ;;  %524 = vrot.lane.b32.xlu1 %v1522_v37, %s1739_s16 }
  0xfe   : > { %502 = vrot.lane.b32.xlu0 %v428_v34, %s1738_s15  ;;  %522 = vrot.lane.b32.xlu1 %v418_v42, %s1739_s16  ;;  %v483_v34 = vsel %vm477_vm12, %v1904_v38, 0.0 }
 0x102   : > { %498 = vrot.lane.b32.xlu1 %v418_v42, %s1738_s15 }
 0x106   : > { %612 = vperm.xlu1 %1644, %v1881_v22  }
 0x10a   : > { %504 = vrot.lane.b32.xlu1 %v1525_v30, %s1738_s15 }
 0x160   : > { %v497_v0 = vpop.permute.xlu1 %496  ;;  %v521_v1 = vpop.permute.xlu0 %520 }
 0x161   : > { %v537_v4 = vrot.slane %v521_v1, 1  ;;  %v513_v35 = vadd.f32 %v497_v0, %v483_v34 }
 0x164   : > { %v1967_v2 = vpop.permute.xlu0 %528  ;;  %v1969_v3 = vpop.permute.xlu1 %518 }
 0x165   : > { %v536_v5 = vrot.slane %v1969_v3, 1  ;;  %v541_v23 = vrot.slane %v1967_v2, 1 }
 0x167   : > { %v547_v6 = vsel %vm542_vm8, %v536_v5, %v537_v4 }
 0x168   : > { %v527_v7 = vpop.permute.xlu0 %526  ;;  %v495_v8 = vpop.permute.xlu1 %494  ;;  %v573_v11 = vsel %vm567_vm10, %v547_v6, 0.0 }
 0x169   : > { %v512_v10 = vadd.f32 %v495_v8, %v482_v9  ;;  %v540_v18 = vrot.slane %v527_v7, 1 }
 0x16b   : > { %v579_v12 = vadd.f32 %v573_v11, %v512_v10  ;;  %v543_v31 = vsel %vm542_vm8, %v540_v18, %v541_v23 }
 0x16c   : > { %v501_v15 = vpop.permute.xlu0 %500  ;;  %v525_v16 = vpop.permute.xlu1 %524  ;;  %v577_v41 = vsel %vm571_vm3, %v543_v31, 0.0 }
 0x16d   : > { %v539_v19 = vrot.slane %v525_v16, 1  ;;  %v615_v21 = vmul.f32 %v1945_v53, %v579_v12  ;;  %v515_v45 = vadd.f32 %v501_v15, %v485_v36 }
 0x16f   : > { %v621_v24 = vsel %vm323_vm0, %v615_v21, 0.0  ;;  %v544_v30 = vsel %vm542_vm8, %v539_v19, %v540_v18 }
 0x170   : > { %622 = vadd.xlane.f32.xlu0 %v621_v24  ;;  %v503_v26 = vpop.permute.xlu0 %502  ;;  %v523_v29 = vpop.permute.xlu1 %522  ;;  %v576_v44 = vsel %vm570_vm1, %v544_v30, 0.0  ;;  %v487_v24 = vsel %vm481_vm4, %v1910_v40, 0.0 }
 0x171   : > { %v516_v32 = vadd.f32 %v503_v26, %v486_v27  ;;  %v538_v33 = vrot.slane %v523_v29, 1  ;;  %v582_v8 = vadd.f32 %v576_v44, %v515_v45 }
 0x173   : > { %v546_v37 = vsel %vm542_vm8, %v537_v4, %v538_v33  ;;  %v545_v39 = vsel %vm542_vm8, %v538_v33, %v539_v19  ;;  %v583_v0 = vadd.f32 %v577_v41, %v516_v32  ;;  %v618_v12 = vmul.f32 %v1961_v61, %v582_v8 }
 0x174   : > { %v499_v42 = vpop.permute.xlu1 %498  ;;  %v574_v38 = vsel %vm568_vm13, %v546_v37, 0.0  ;;  %v575_v4 = vsel %vm569_vm2, %v545_v39, 0.0  ;;  %v548_v19 = vsel %vm542_vm8, %v541_v23, %v536_v5 }
 0x175   : > { %v514_v1 = vadd.f32 %v499_v42, %v484_v43  ;;  %v580_v2 = vadd.f32 %v574_v38, %v513_v35  ;;  %v619_v10 = vmul.f32 %v1965_v63, %v583_v0  ;;  %v630_v16 = vsel %vm323_vm0, %v618_v12, 0.0 }
 0x176   : > { %v578_v29 = vsel %vm572_vm5, %v548_v19, 0.0  ;;  %v1455_v19 = vld [vmem:[%s2368_s2 + $0x28] sm:$0xff] }
 0x177   : > { %v581_v6 = vadd.f32 %v575_v4, %v514_v1  ;;  %v616_v7 = vmul.f32 %v1935_v48, %v580_v2  ;;  %v633_v15 = vsel %vm323_vm0, %v619_v10, 0.0 }
 0x179   : > { %v624_v9 = vsel %vm323_vm0, %v616_v7, 0.0  ;;  %v617_v46 = vmul.f32 %v1957_v59, %v581_v6 }
 0x17a   : > { %625 = vadd.xlane.f32.xlu1 %v624_v9 }
 0x17b   : > { %v627_v11 = vsel %vm323_vm0, %v617_v46, 0.0 }
 0x17c   : > { %628 = vadd.xlane.f32.xlu0 %v627_v11 }
 0x17e   : > { %634 = vadd.xlane.f32.xlu1 %v633_v15 }
 0x180   : > { %631 = vadd.xlane.f32.xlu0 %v630_v16  ;;  %v1454_v16 = vld [vmem:[%s2368_s2 + $0x20] sm:$0xff] }
 0x185   : > { %v2029_v18 = vpop.permute.xlu1 %612 }
 0x189   : > { %v505_v26 = vpop.permute.xlu1 %504 }
 0x18a   : > { %v517_v27 = vadd.f32 %v505_v26, %v487_v24  ;;  %v1568_v24 = vpack.c.bf16 %v1455_v19, %v1454_v16  ;;  %v1456_v26 = vld [vmem:[%s2368_s2 + $0x30] sm:$0xff] }
 0x18c   : > { %v584_v30 = vadd.f32 %v578_v29, %v517_v27  ;;  %v1457_v27 = vld [vmem:[%s2368_s2 + $0x38] sm:$0xff]  ;;  %1569 = vmatprep.subr.bf16.mxu1 %v1568_v24 }
 0x18d   : > { %v1572_v29 = vpack.c.bf16 %v1457_v27, %v1456_v26  ;;  %1571 = vmatpush3.bf16.msra.mxu1 %v1568_v24 }
 0x18e   : > { %v620_v31 = vmul.f32 %v2029_v18, %v584_v30 }
 0x18f   : > { %1573 = vmatprep.subr.bf16.mxu1 %v1572_v29 }
 0x190   : > { %v636_v32 = vsel %vm323_vm0, %v620_v31, 0.0 }
 0x191   : > { %637 = vadd.xlane.f32.xlu0 %v636_v32  ;;  %1575 = vmatpush3.bf16.msra.mxu1 %v1572_v29 }
 0x1fd   : > { %v623_v3 = vpop.xlane.xlu0 %622 }
 0x1fe   : > { %v640_v33 = vmul.f32 0.03125, %v623_v3 }
 0x200   : > { %v2044_v5 = vsub.f32 %v615_v21, %v640_v33 }
 0x202   : > { %v652_v40 = vmul.f32 %v2044_v5, %v2044_v5 }
 0x204   : > { %v658_v23 = vsel %vm323_vm0, %v652_v40, 0.0 }
 0x205   : > { %659 = vadd.xlane.f32.xlu1 %v658_v23  ;;  %v1452_v23 = vld [vmem:[%s2369_s3] ss:$0 sm:$0xff] }
 0x207   : > { %v626_v34 = vpop.xlane.xlu1 %625 }
 0x208   : > { %v641_v35 = vmul.f32 0.03125, %v626_v34 }
 0x209   : > { %v629_v36 = vpop.xlane.xlu0 %628 }
 0x20a   : > { %v2049_v37 = vsub.f32 %v616_v7, %v641_v35  ;;  %v642_v39 = vmul.f32 0.03125, %v629_v36 }
 0x20b   : > { %v635_v41 = vpop.xlane.xlu1 %634 }
 0x20c   : > { %v2051_v42 = vsub.f32 %v617_v46, %v642_v39  ;;  %v644_v43 = vmul.f32 0.03125, %v635_v41  ;;  %v653_v21 = vmul.f32 %v2049_v37, %v2049_v37 }
 0x20d   : > { %v632_v38 = vpop.xlane.xlu0 %631 }
 0x20e   : > { %v2055_v44 = vsub.f32 %v619_v10, %v644_v43  ;;  %v643_v45 = vmul.f32 0.03125, %v632_v38  ;;  %v661_v0 = vsel %vm323_vm0, %v653_v21, 0.0  ;;  %v654_v1 = vmul.f32 %v2051_v42, %v2051_v42 }
 0x20f   : > { %662 = vadd.xlane.f32.xlu0 %v661_v0  ;;  %v1453_v0 = vld [vmem:[%s2370_s4] ss:$0 sm:$0xff] }
 0x210   : > { %v2060_v2 = vsub.f32 %v618_v12, %v643_v45  ;;  %v664_v4 = vsel %vm323_vm0, %v654_v1, 0.0  ;;  %v656_v6 = vmul.f32 %v2055_v44, %v2055_v44 }
 0x211   : > { %665 = vadd.xlane.f32.xlu1 %v664_v4 }
 0x212   : > { %v655_v7 = vmul.f32 %v2060_v2, %v2060_v2  ;;  %v670_v8 = vsel %vm323_vm0, %v656_v6, 0.0 }
 0x214   : > { %v667_v9 = vsel %vm323_vm0, %v655_v7, 0.0 }
 0x215   : > { %671 = vadd.xlane.f32.xlu1 %v670_v8  ;;  %668 = vadd.xlane.f32.xlu0 %v667_v9 }
 0x21e   : > { %v638_v46 = vpop.xlane.xlu0 %637 }
 0x21f   : > { %v645_v10 = vmul.f32 0.03125, %v638_v46 }
 0x221   : > { %v2069_v11 = vsub.f32 %v620_v31, %v645_v10 }
 0x223   : > { %v657_v12 = vmul.f32 %v2069_v11, %v2069_v11 }
 0x225   : > { %v673_v15 = vsel %vm323_vm0, %v657_v12, 0.0 }
 0x226   : > { %674 = vadd.xlane.f32.xlu0 %v673_v15 }
 0x292   : > { %v660_v30 = vpop.xlane.xlu1 %659 }
 0x293   : > { %v676_v31 = vmul.f32 0.03125, %v660_v30 }
 0x295   : > { %v682_v32 = vadd.f32 1e-05, %v676_v31 }
 0x297   : > { %1647 = vrsqrt.f32 %v682_v32 }
 0x29c   : > { %v663_v3 = vpop.xlane.xlu0 %662 }
 0x29d   : > { %v677_v33 = vmul.f32 0.03125, %v663_v3 }
 0x29e   : > { %v666_v40 = vpop.xlane.xlu1 %665 }
 0x29f   : > { %v683_v34 = vadd.f32 1e-05, %v677_v33  ;;  %v678_v35 = vmul.f32 0.03125, %v666_v40 }
 0x2a1   : > { %v1648_v36 = vpop.eup %1647  ;;  %1649 = vrsqrt.f32 %v683_v34  ;;  %v684_v39 = vadd.f32 1e-05, %v678_v35 }
 0x2a2   : > { %v672_v41 = vpop.xlane.xlu1 %671  ;;  %v669_v43 = vpop.xlane.xlu0 %668  ;;  %v701_v21 = vmul.f32 %v1648_v36, %v1452_v23 }
 0x2a3   : > { %1651 = vrsqrt.f32 %v684_v39  ;;  %v680_v38 = vmul.f32 0.03125, %v672_v41  ;;  %v679_v45 = vmul.f32 0.03125, %v669_v43 }
 0x2a4   : > { %v707_v1 = vmul.f32 %v701_v21, %v2044_v5 }
 0x2a5   : > { %v686_v4 = vadd.f32 1e-05, %v680_v38  ;;  %v685_v6 = vadd.f32 1e-05, %v679_v45 }
 0x2a6   : > { %v720_v7 = vadd.f32 %v1453_v0, %v707_v1 }
 0x2a7   : > { %1653 = vrsqrt.f32 %v686_v4 }
 0x2a8   : > { %1655 = vrsqrt.f32 %v685_v6  ;;  %v726_v8 = vmax.f32 %v720_v7, 0.0 }
 0x2aa   : > { %1534 = vmatprep.mubr.msk.f32.mxu1 %vm323_vm0, %v726_v8 }
 0x2ab   : > { %v1650_v9 = vpop.eup %1649 }
 0x2ac   : > { %v702_v46 = vmul.f32 %v1650_v9, %v1452_v23 }
 0x2ad   : > { %v1652_v10 = vpop.eup %1651 }
 0x2ae   : > { %v708_v12 = vmul.f32 %v702_v46, %v2049_v37  ;;  %v703_v15 = vmul.f32 %v1652_v10, %v1452_v23 }
 0x2b0   : > { %v721_v16 = vadd.f32 %v1453_v0, %v708_v12  ;;  %v709_v19 = vmul.f32 %v703_v15, %v2051_v42 }
 0x2b1   : > { %v1654_v24 = vpop.eup %1653 }
 0x2b2   : > { %v1656_v26 = vpop.eup %1655  ;;  %v727_v5 = vmax.f32 %v721_v16, 0.0  ;;  %v722_v27 = vadd.f32 %v1453_v0, %v709_v19  ;;  %v705_v29 = vmul.f32 %v1654_v24, %v1452_v23 }
 0x2b3   : > { %v675_v30 = vpop.xlane.xlu0 %674  ;;  %v704_v31 = vmul.f32 %v1656_v26, %v1452_v23 }
 0x2b4   : > { %v681_v32 = vmul.f32 0.03125, %v675_v30  ;;  %1535 = vmatmul.mubr.msk.f32.vlgmr.msra.gmra.mrb[2].mxu1 %vm323_vm0, %v727_v5  ;;  %v728_v3 = vmax.f32 %v722_v27, 0.0  ;;  %v711_v33 = vmul.f32 %v705_v29, %v2055_v44 }
 0x2b5   : > { %v710_v40 = vmul.f32 %v704_v31, %v2060_v2 }
 0x2b6   : > { %v687_v37 = vadd.f32 1e-05, %v681_v32  ;;  %1537 = vmatprep.mubr.msk.f32.mxu1 %vm323_vm0, %v728_v3  ;;  %v724_v34 = vadd.f32 %v1453_v0, %v711_v33 }
 0x2b7   : > { %v723_v42 = vadd.f32 %v1453_v0, %v710_v40 }
 0x2b8   : > { %1657 = vrsqrt.f32 %v687_v37  ;;  %v730_v35 = vmax.f32 %v724_v34, 0.0 }
 0x2b9   : > { %v729_v36 = vmax.f32 %v723_v42, 0.0 }
 0x2bb   : > { %1538 = vmatmul.mubr.msk.f32.gmra.mrb[4].mxu1 %vm323_vm0, %v729_v36 }
 0x2bc   : > { %1540 = vmatprep.mubr.msk.f32.mxu1 %vm323_vm0, %v730_v35 }
 0x2c2   : > { %v1658_v39 = vpop.eup %1657 }
 0x2c3   : > { %v706_v41 = vmul.f32 %v1658_v39, %v1452_v23 }
 0x2c5   : > { %v712_v43 = vmul.f32 %v706_v41, %v2069_v11 }
 0x2c7   : > { %v725_v21 = vadd.f32 %v1453_v0, %v712_v43 }
 0x2c9   : > { %v731_v44 = vmax.f32 %v725_v21, 0.0 }
 0x2cb   : > { %1541 = vmatmul.mubr.msk.f32.gmra.mrb[6].mxu1 %vm323_vm0, %v731_v44 }
 0x387   : > { %v1536_v2 = vpop.f32.mrb[2].mxu1 }
 0x388   : > { %v851_v38 = vrot.slane %v1536_v2, 7  ;;  %900 = vrot.lane.b32.xlu0 %v1536_v2, %s1739_s16  ;;  %v821_v45 = vpop.f32.mrb[3].mxu1 }
 0x389   : > { %v850_v1 = vrot.slane %v821_v45, 7  ;;  %898 = vrot.lane.b32.xlu1 %v821_v45, %s1739_s16 }
 0x38b   : > { %v860_v4 = vsel %vm445_vm7, %v850_v1, %v851_v38 }
 0x38c   : > { %876 = vrot.lane.b32.xlu0 %v1536_v2, %s1738_s15  ;;  %v863_v41 = vsel %vm477_vm12, %v860_v4, 0.0 }
 0x38d   : > { %874 = vrot.lane.b32.xlu1 %v821_v45, %s1738_s15 }
 0x38e   : > { %v1539_v11 = vpop.f32.mrb[4].mxu1 }
 0x38f   : > { %v853_v23 = vrot.slane %v1539_v11, 7  ;;  %v831_v0 = vpop.f32.mrb[5].mxu1 }
 0x390   : > { %v852_v6 = vrot.slane %v831_v0, 7 }
 0x391   : > { %904 = vrot.lane.b32.xlu1 %v1539_v11, %s1739_s16 }
 0x392   : > { %v859_v7 = vsel %vm445_vm7, %v851_v38, %v852_v6  ;;  %v858_v8 = vsel %vm445_vm7, %v852_v6, %v853_v23 }
 0x393   : > { %v864_v38 = vsel %vm478_vm15, %v859_v7, 0.0 }
 0x395   : > { %902 = vrot.lane.b32.xlu1 %v831_v0, %s1739_s16 }
 0x399   : > { %878 = vrot.lane.b32.xlu1 %v831_v0, %s1738_s15 }
 0x39e   : > { %v1542_v9 = vpop.f32.mrb[6].mxu1 }
 0x39f   : > { %v855_v46 = vrot.slane %v1542_v9, 7  ;;  %908 = vrot.lane.b32.xlu1 %v1542_v9, %s1739_s16  ;;  %v841_v10 = vpop.f32.mrb[7].mxu1 }
 0x3a0   : > { %v854_v12 = vrot.slane %v841_v10, 7  ;;  %906 = vrot.lane.b32.xlu0 %v841_v10, %s1739_s16 }
 0x3a1   : > { %v861_v15 = vsel %vm445_vm7, %v855_v46, %v850_v1 }
 0x3a2   : > { %v856_v16 = vsel %vm445_vm7, %v854_v12, %v855_v46  ;;  %v857_v19 = vsel %vm445_vm7, %v853_v23, %v854_v12  ;;  %v862_v31 = vsel %vm476_vm9, %v861_v15, 0.0 }
 0x3a3   : > { %884 = vrot.lane.b32.xlu1 %v1542_v9, %s1738_s15 }
 0x3a4   : > { %880 = vrot.lane.b32.xlu0 %v1539_v11, %s1738_s15 }
 0x3a8   : > { %882 = vrot.lane.b32.xlu0 %v841_v10, %s1738_s15 }
 0x3fa   : > { %v901_v24 = vpop.permute.xlu0 %900 }
 0x3fb   : > { %v917_v26 = vrot.slane %v901_v24, 1  ;;  %v899_v5 = vpop.permute.xlu1 %898 }
 0x3fc   : > { %v916_v27 = vrot.slane %v899_v5, 1  ;;  %v867_v5 = vsel %vm481_vm4, %v856_v16, 0.0 }
 0x3fe   : > { %v926_v29 = vsel %vm542_vm8, %v916_v27, %v917_v26  ;;  %v877_v42 = vpop.permute.xlu0 %876 }
 0x3ff   : > { %v875_v30 = vpop.permute.xlu1 %874  ;;  %v928_v3 = vsel %vm567_vm10, %v926_v29, 0.0  ;;  %v893_v43 = vadd.f32 %v877_v42, %v863_v41  ;;  %v866_v42 = vsel %vm480_vm11, %v857_v19, 0.0 }
 0x400   : > { %v892_v32 = vadd.f32 %v875_v30, %v862_v31  ;;  %v865_v31 = vsel %vm479_vm14, %v858_v8, 0.0 }
 0x402   : > { %v934_v33 = vadd.f32 %v928_v3, %v892_v32 }
 0x403   : > { %v905_v40 = vpop.permute.xlu1 %904 }
 0x404   : > { %v940_v37 = vmul.f32 %v934_v33, %v1945_v53  ;;  %v919_v36 = vrot.slane %v905_v40, 1 }
 0x406   : > { %v946_v34 = vsel %vm323_vm0, %v940_v37, 0.0 }
 0x407   : > { %v903_v35 = vpop.permute.xlu1 %902  ;;  %947 = vadd.xlane.f32.xlu0 %v946_v34 }
 0x408   : > { %v918_v39 = vrot.slane %v903_v35, 1 }
 0x40a   : > { %v925_v21 = vsel %vm542_vm8, %v917_v26, %v918_v39  ;;  %v924_v44 = vsel %vm542_vm8, %v918_v39, %v919_v36 }
 0x40b   : > { %v879_v2 = vpop.permute.xlu1 %878  ;;  %v929_v45 = vsel %vm568_vm13, %v925_v21, 0.0  ;;  %v930_v23 = vsel %vm569_vm2, %v924_v44, 0.0 }
 0x40c   : > { %v894_v1 = vadd.f32 %v879_v2, %v864_v38  ;;  %v935_v11 = vadd.f32 %v929_v45, %v893_v43 }
 0x40e   : > { %v936_v4 = vadd.f32 %v930_v23, %v894_v1  ;;  %v941_v0 = vmul.f32 %v935_v11, %v1935_v48 }
 0x410   : > { %v949_v6 = vsel %vm323_vm0, %v941_v0, 0.0  ;;  %v942_v9 = vmul.f32 %v936_v4, %v1957_v59 }
 0x411   : > { %v909_v46 = vpop.permute.xlu1 %908  ;;  %950 = vadd.xlane.f32.xlu1 %v949_v6 }
 0x412   : > { %v921_v10 = vrot.slane %v909_v46, 1  ;;  %v907_v12 = vpop.permute.xlu0 %906  ;;  %v952_v7 = vsel %vm323_vm0, %v942_v9, 0.0 }
 0x413   : > { %v920_v15 = vrot.slane %v907_v12, 1  ;;  %953 = vadd.xlane.f32.xlu0 %v952_v7 }
 0x414   : > { %v927_v24 = vsel %vm542_vm8, %v921_v10, %v916_v27 }
 0x415   : > { %v885_v26 = vpop.permute.xlu1 %884  ;;  %v923_v29 = vsel %vm542_vm8, %v919_v36, %v920_v15  ;;  %v933_v33 = vsel %vm572_vm5, %v927_v24, 0.0  ;;  %v922_v16 = vsel %vm542_vm8, %v920_v15, %v921_v10 }
 0x416   : > { %v897_v30 = vadd.f32 %v885_v26, %v867_v5  ;;  %v881_v32 = vpop.permute.xlu0 %880  ;;  %v931_v40 = vsel %vm570_vm1, %v923_v29, 0.0  ;;  %v932_v39 = vsel %vm571_vm3, %v922_v16, 0.0 }
 0x417   : > { %v895_v3 = vadd.f32 %v881_v32, %v865_v31 }
 0x418   : > { %v939_v27 = vadd.f32 %v933_v33, %v897_v30 }
 0x419   : > { %v937_v34 = vadd.f32 %v931_v40, %v895_v3 }
 0x41a   : > { %v883_v35 = vpop.permute.xlu0 %882  ;;  %v945_v21 = vmul.f32 %v939_v27, %v2029_v18 }
 0x41b   : > { %v896_v36 = vadd.f32 %v883_v35, %v866_v42  ;;  %v943_v8 = vmul.f32 %v937_v34, %v1961_v61 }
 0x41c   : > { %v961_v2 = vsel %vm323_vm0, %v945_v21, 0.0 }
 0x41d   : > { %v938_v41 = vadd.f32 %v932_v39, %v896_v36  ;;  %v955_v43 = vsel %vm323_vm0, %v943_v8, 0.0  ;;  %v1058_v36 = vld [vmem:[%s2371_s5] sm:$0xff] }
 0x41e   : > { %956 = vadd.xlane.f32.xlu0 %v955_v43  ;;  %v1061_v43 = vld [vmem:[%s2371_s5 + $0x18] sm:$0xff] }
 0x41f   : > { %v944_v44 = vmul.f32 %v938_v41, %v1965_v63  ;;  %v1060_v41 = vld [vmem:[%s2371_s5 + $0x10] sm:$0xff] }
 0x421   : > { %v958_v38 = vsel %vm323_vm0, %v944_v44, 0.0 }
 0x422   : > { %962 = vadd.xlane.f32.xlu0 %v961_v2  ;;  %959 = vadd.xlane.f32.xlu1 %v958_v38 }
 0x494   : > { %v948_v19 = vpop.xlane.xlu0 %947 }
 0x495   : > { %v964_v45 = vmul.f32 0.03125, %v948_v19 }
 0x497   : > { %v2176_v1 = vsub.f32 %v940_v37, %v964_v45 }
 0x499   : > { %v976_v11 = vmul.f32 %v2176_v1, %v2176_v1 }
 0x49b   : > { %v982_v23 = vsel %vm323_vm0, %v976_v11, 0.0 }
 0x49c   : > { %983 = vadd.xlane.f32.xlu1 %v982_v23 }
 0x49e   : > { %v951_v4 = vpop.xlane.xlu1 %950 }
 0x49f   : > { %v965_v6 = vmul.f32 0.03125, %v951_v4  ;;  %v1465_v4 = vld [vmem:[%s2369_s3 + $0x1] ss:$0 sm:$0xff] }
 0x4a0   : > { %v954_v46 = vpop.xlane.xlu0 %953 }
 0x4a1   : > { %v2181_v10 = vsub.f32 %v941_v0, %v965_v6  ;;  %v966_v12 = vmul.f32 0.03125, %v954_v46 }
 0x4a3   : > { %v2183_v7 = vsub.f32 %v942_v9, %v966_v12  ;;  %v977_v15 = vmul.f32 %v2181_v10, %v2181_v10 }
 0x4a5   : > { %v985_v37 = vsel %vm323_vm0, %v977_v15, 0.0  ;;  %v978_v24 = vmul.f32 %v2183_v7, %v2183_v7 }
 0x4a6   : > { %986 = vadd.xlane.f32.xlu0 %v985_v37 }
 0x4a7   : > { %v988_v26 = vsel %vm323_vm0, %v978_v24, 0.0 }
 0x4a8   : > { %989 = vadd.xlane.f32.xlu1 %v988_v26 }
 0x4ab   : > { %v957_v5 = vpop.xlane.xlu0 %956 }
 0x4ac   : > { %v967_v29 = vmul.f32 0.03125, %v957_v5 }
 0x4ae   : > { %v2191_v30 = vsub.f32 %v943_v8, %v967_v29  ;;  %v1059_v8 = vld [vmem:[%s2371_s5 + $0x8] sm:$0xff] }
 0x4af   : > { %v960_v0 = vpop.xlane.xlu1 %959  ;;  %v963_v31 = vpop.xlane.xlu0 %962  ;;  %v1576_v39 = vpack.c.bf16 %v1059_v8, %v1058_v36 }
 0x4b0   : > { %v968_v9 = vmul.f32 0.03125, %v960_v0  ;;  %v969_v32 = vmul.f32 0.03125, %v963_v31  ;;  %v979_v3 = vmul.f32 %v2191_v30, %v2191_v30 }
 0x4b1   : > { %1577 = vmatprep.subr.bf16.mxu0 %v1576_v39 }
 0x4b2   : > { %v2195_v33 = vsub.f32 %v944_v44, %v968_v9  ;;  %v2197_v40 = vsub.f32 %v945_v21, %v969_v32  ;;  %v991_v27 = vsel %vm323_vm0, %v979_v3, 0.0  ;;  %1579 = vmatpush3.bf16.msra.mxu0 %v1576_v39  ;;  %v1580_v21 = vpack.c.bf16 %v1061_v43, %v1060_v41 }
 0x4b3   : > { %992 = vadd.xlane.f32.xlu0 %v991_v27  ;;  %v1740_v44 = vmov 3  }
 0x4b4   : > { %v980_v34 = vmul.f32 %v2195_v33, %v2195_v33  ;;  %v981_v16 = vmul.f32 %v2197_v40, %v2197_v40  ;;  %1581 = vmatprep.subr.bf16.mxu0 %v1580_v21  ;;  %1645 = vset.pattern.permute.xlu0 %v1740_v44 }
 0x4b5   : > { %1646 = vset.pattern.permute.xlu1 %v1740_v44 }
 0x4b6   : > { %v994_v42 = vsel %vm323_vm0, %v980_v34, 0.0  ;;  %v997_v35 = vsel %vm323_vm0, %v981_v16, 0.0  ;;  %1583 = vmatpush3.bf16.msra.mxu0 %v1580_v21 }
 0x4b7   : > { %995 = vadd.xlane.f32.xlu1 %v994_v42  ;;  %998 = vadd.xlane.f32.xlu0 %v997_v35 }
 0x4c8   : > { %1293 = vperm.xlu1 %1646, %v1876_v20  }
 0x4cd   : > { %1285 = vperm.xlu0 %1645, %v1857_v13  }
 0x4d1   : > { %1289 = vperm.xlu0 %1645, %v1860_v14   ;;  %v1467_v14 = vld [vmem:[%s2370_s4 + $0x1] ss:$0 sm:$0xff] }
 0x4d5   : > { %1297 = vperm.xlu0 %1645, %v1870_v17  }
 0x529   : > { %v984_v2 = vpop.xlane.xlu1 %983 }
 0x52a   : > { %v1000_v38 = vmul.f32 0.03125, %v984_v2 }
 0x52c   : > { %v1006_v19 = vadd.f32 1e-05, %v1000_v38 }
 0x52e   : > { %1659 = vrsqrt.f32 %v1006_v19 }
 0x533   : > { %v987_v45 = vpop.xlane.xlu0 %986 }
 0x534   : > { %v1001_v11 = vmul.f32 0.03125, %v987_v45 }
 0x535   : > { %v990_v23 = vpop.xlane.xlu1 %989 }
 0x536   : > { %v1007_v6 = vadd.f32 1e-05, %v1001_v11  ;;  %v1002_v46 = vmul.f32 0.03125, %v990_v23 }
 0x538   : > { %v1660_v13 = vpop.eup %1659  ;;  %1661 = vrsqrt.f32 %v1007_v6  ;;  %v1008_v20 = vadd.f32 1e-05, %v1002_v46 }
 0x539   : > { %v1026_v12 = vmul.f32 %v1660_v13, %v1465_v4 }
 0x53a   : > { %1663 = vrsqrt.f32 %v1008_v20 }
 0x53b   : > { %v1032_v17 = vmul.f32 %v1026_v12, %v2176_v1 }
 0x53d   : > { %v1046_v15 = vadd.f32 %v1467_v14, %v1032_v17 }
 0x53f   : > { %v1052_v37 = vmax.f32 %v1046_v15, 0.0 }
 0x540   : > { %v993_v24 = vpop.xlane.xlu0 %992 }
 0x541   : > { %v1003_v26 = vmul.f32 0.03125, %v993_v24  ;;  %1551 = vmatprep.mubr.msk.f32.mxu0 %vm323_vm0, %v1052_v37 }
 0x542   : > { %v1662_v5 = vpop.eup %1661 }
 0x543   : > { %v1027_v29 = vmul.f32 %v1662_v5, %v1465_v4  ;;  %v1009_v0 = vadd.f32 1e-05, %v1003_v26 }
 0x544   : > { %v1664_v31 = vpop.eup %1663  ;;  %v996_v9 = vpop.xlane.xlu1 %995 }
 0x545   : > { %v999_v32 = vpop.xlane.xlu0 %998  ;;  %v1033_v3 = vmul.f32 %v1027_v29, %v2181_v10  ;;  %1665 = vrsqrt.f32 %v1009_v0  ;;  %v1004_v27 = vmul.f32 0.03125, %v996_v9  ;;  %v1028_v16 = vmul.f32 %v1664_v31, %v1465_v4 }
 0x546   : > { %v1005_v34 = vmul.f32 0.03125, %v999_v32 }
 0x547   : > { %v1047_v42 = vadd.f32 %v1467_v14, %v1033_v3  ;;  %v1010_v1 = vadd.f32 1e-05, %v1004_v27  ;;  %v1034_v36 = vmul.f32 %v1028_v16, %v2183_v7 }
 0x548   : > { %v1011_v35 = vadd.f32 1e-05, %v1005_v34  ;;  %v1294_v16 = vpop.permute.xlu1 %1293 }
 0x549   : > { %v1053_v8 = vmax.f32 %v1047_v42, 0.0  ;;  %1667 = vrsqrt.f32 %v1010_v1  ;;  %v1048_v39 = vadd.f32 %v1467_v14, %v1034_v36 }
 0x54a   : > { %1669 = vrsqrt.f32 %v1011_v35 }
 0x54b   : > { %1552 = vmatmul.mubr.msk.f32.vlgmr.msra.gmra.mrb[4].mxu0 %vm323_vm0, %v1053_v8  ;;  %v1054_v41 = vmax.f32 %v1048_v39, 0.0 }
 0x54c   : > { %v1286_v27 = vpop.permute.xlu0 %1285 }
 0x54d   : > { %1554 = vmatprep.mubr.msk.f32.mxu0 %vm323_vm0, %v1054_v41 }
 0x54f   : > { %v1666_v43 = vpop.eup %1665 }
 0x550   : > { %v1029_v10 = vmul.f32 %v1666_v43, %v1465_v4  ;;  %v1290_v34 = vpop.permute.xlu0 %1289 }
 0x552   : > { %v1035_v21 = vmul.f32 %v1029_v10, %v2191_v30  ;;  %v2271_v10 = vld [vmem:[%s2372_s6] ss:$0 sm:$0xff] }
 0x553   : > { %v1668_v44 = vpop.eup %1667 }
 0x554   : > { %v1670_v2 = vpop.eup %1669  ;;  %v1049_v38 = vadd.f32 %v1467_v14, %v1035_v21  ;;  %v1030_v19 = vmul.f32 %v1668_v44, %v1465_v4  ;;  %v2262_v42 = vpop.permute.xlu0 %1297 }
 0x555   : > { %v1031_v45 = vmul.f32 %v1670_v2, %v1465_v4 }
 0x556   : > { %v1055_v11 = vmax.f32 %v1049_v38, 0.0  ;;  %v1036_v7 = vmul.f32 %v1030_v19, %v2195_v33 }
 0x557   : > { %v1037_v23 = vmul.f32 %v1031_v45, %v2197_v40 }
 0x558   : > { %1555 = vmatmul.mubr.msk.f32.gmra.mrb[6].mxu0 %vm323_vm0, %v1055_v11  ;;  %v1050_v6 = vadd.f32 %v1467_v14, %v1036_v7 }
 0x559   : > { %v1051_v46 = vadd.f32 %v1467_v14, %v1037_v23 }
 0x55a   : > { %v1056_v13 = vmax.f32 %v1050_v6, 0.0 }
 0x55b   : > { %v1057_v20 = vmax.f32 %v1051_v46, 0.0 }
 0x55c   : > { %1557 = vmatprep.mubr.msk.f32.mxu0 %vm323_vm0, %v1056_v13 }
 0x55d   : > { %1558 = vmatmul.mubr.msk.f32.gmra.mrb[8].mxu0 %vm323_vm0, %v1057_v20  ;;  %vm1352_vm0 = vcmask 386048  }
 0x61e   : > { %v1553_v30 = vpop.f32.mrb[4].mxu0 }
 0x61f   : > { %v1176_v12 = vrot.slane %v1553_v30, 7  ;;  %1201 = vrot.lane.b32.xlu1 %v1553_v30, %s1741_s13  ;;  %1225 = vrot.lane.b32.xlu0 %v1553_v30, %s1742_s14  ;;  %v1146_v33 = vpop.f32.mrb[5].mxu0 }
 0x620   : > { %v1175_v4 = vrot.slane %v1146_v33, 7 }
 0x622   : > { %v1185_v40 = vsel %vm445_vm7, %v1175_v4, %v1176_v12 }
 0x623   : > { %1223 = vrot.lane.b32.xlu1 %v1146_v33, %s1742_s14  ;;  %v1188_v6 = vsel %vm477_vm12, %v1185_v40, 0.0 }
 0x627   : > { %1199 = vrot.lane.b32.xlu1 %v1146_v33, %s1741_s13 }
 0x62b   : > { %v1556_v14 = vpop.f32.mrb[6].mxu0 }
 0x62c   : > { %v1178_v17 = vrot.slane %v1556_v14, 7  ;;  %1205 = vrot.lane.b32.xlu0 %v1556_v14, %s1741_s13  ;;  %1229 = vrot.lane.b32.xlu1 %v1556_v14, %s1742_s14  ;;  %v1156_v15 = vpop.f32.mrb[7].mxu0 }
 0x62d   : > { %v1177_v37 = vrot.slane %v1156_v15, 7 }
 0x62f   : > { %v1183_v24 = vsel %vm445_vm7, %v1177_v37, %v1178_v17  ;;  %v1184_v26 = vsel %vm445_vm7, %v1176_v12, %v1177_v37 }
 0x630   : > { %1227 = vrot.lane.b32.xlu1 %v1156_v15, %s1742_s14  ;;  %v1559_v5 = vpop.f32.mrb[8].mxu0  ;;  %v1189_v52 = vsel %vm478_vm15, %v1184_v26, 0.0 }
 0x631   : > { %v1180_v29 = vrot.slane %v1559_v5, 7  ;;  %v1166_v0 = vpop.f32.mrb[9].mxu0 }
 0x632   : > { %v1179_v31 = vrot.slane %v1166_v0, 7  ;;  %1231 = vrot.lane.b32.xlu0 %v1166_v0, %s1742_s14 }
 0x633   : > { %v1186_v9 = vsel %vm445_vm7, %v1180_v29, %v1175_v4 }
 0x634   : > { %1203 = vrot.lane.b32.xlu1 %v1156_v15, %s1741_s13  ;;  %v1182_v32 = vsel %vm445_vm7, %v1178_v17, %v1179_v31  ;;  %v2256_v3 = vsel %vm445_vm7, %v1179_v31, %v1180_v29 }
 0x636   : > { %1301 = vperm.xlu0 %1645, %v1889_v25  }
 0x638   : > { %1233 = vrot.lane.b32.xlu1 %v1559_v5, %s1742_s14 }
 0x63a   : > { %1305 = vperm.xlu0 %1645, %v1881_v22   ;;  %v1187_v22 = vsel %vm476_vm9, %v1186_v9, 0.0 }
 0x63c   : > { %1207 = vrot.lane.b32.xlu1 %v1166_v0, %s1741_s13 }
 0x640   : > { %1209 = vrot.lane.b32.xlu1 %v1559_v5, %s1741_s13  ;;  %s1675_s13 = sshll.u32 %s1743_s28, 4  ;;  %s1676_s13 = int_to_ptr.vmem [resolvable:$false] %s1675_s13 }
 0x641   : > { %s1677_s14 = scalar_lea.vmem %s1676_s13, 64  ;;  %p1678_p0 = scmp.lt.s32.totalorder %s2326_s21, %s1676_s13 }
 0x642   : > { %p1679_p1 = scmp.lt.s32.totalorder %s1677_s14, %s1671_s9 }
 0x644   : > { %p1680_p2 = por %p1679_p1, %p1678_p0 }
 0x646   : > { %p1681_p3 = pnand %p1680_p2, %p1674_p13 }
 0x691   : > { %v1202_v1 = vpop.permute.xlu1 %1201  ;;  %v1226_v35 = vpop.permute.xlu0 %1225 }
 0x692   : > { %v1242_v8 = vrot.slane %v1226_v35, 1  ;;  %v1218_v20 = vadd.f32 %v1202_v1, %v1188_v6  ;;  %v1191_v1 = vsel %vm480_vm11, %v1182_v32, 0.0 }
 0x695   : > { %v1224_v36 = vpop.permute.xlu1 %1223 }
 0x696   : > { %v1241_v39 = vrot.slane %v1224_v36, 1 }
 0x698   : > { %v1251_v25 = vsel %vm542_vm8, %v1241_v39, %v1242_v8 }
 0x699   : > { %v1200_v41 = vpop.permute.xlu1 %1199  ;;  %v1253_v21 = vsel %vm567_vm10, %v1251_v25, 0.0 }
 0x69a   : > { %v1217_v43 = vadd.f32 %v1200_v41, %v1187_v22 }
 0x69c   : > { %v1259_v44 = vadd.f32 %v1253_v21, %v1217_v43 }
 0x69e   : > { %v1272_v2 = vadd.f32 %v2271_v10, %v1259_v44  ;;  %v1230_v38 = vpop.permute.xlu1 %1229  ;;  %v1206_v19 = vpop.permute.xlu0 %1205 }
 0x69f   : > { %v1244_v50 = vrot.slane %v1230_v38, 1 }
 0x6a0   : > { %v1278_v45 = vmul.f32 %v1272_v2, %v1945_v53  ;;  %v1190_v53 = vsel %vm479_vm14, %v1183_v24, 0.0 }
 0x6a1   : > { %v1220_v40 = vadd.f32 %v1206_v19, %v1190_v53 }
 0x6a2   : > { %v1228_v11 = vpop.permute.xlu1 %1227  ;;  %v1308_v7 = vmul.f32 %v1286_v27, %v1278_v45 }
 0x6a3   : > { %v1243_v23 = vrot.slane %v1228_v11, 1 }
 0x6a4   : > { %v1232_v46 = vpop.permute.xlu0 %1231  ;;  %v1314_v13 = vmax.f32 %v1308_v7, 0.0 }
 0x6a5   : > { %v1250_v47 = vsel %vm542_vm8, %v1242_v8, %v1243_v23  ;;  %v1245_v30 = vrot.slane %v1232_v46, 1  ;;  %v1249_v12 = vsel %vm542_vm8, %v1243_v23, %v1244_v50 }
 0x6a6   : > { %v1254_v33 = vsel %vm568_vm13, %v1250_v47, 0.0  ;;  %v1204_v4 = vpop.permute.xlu1 %1203  ;;  %1320 = vxpose.xlu1.b32.start [1/6] (short) (narrow) %v1314_v13, 8  ;;  %v1255_v51 = vsel %vm569_vm2, %v1249_v12, 0.0 }
 0x6a7   : > { %v1260_v14 = vadd.f32 %v1254_v33, %v1218_v20  ;;  %v1248_v17 = vsel %vm542_vm8, %v1244_v50, %v1245_v30  ;;  %v1219_v15 = vadd.f32 %v1204_v4, %v1189_v52 }
 0x6a8   : > { %v1256_v37 = vsel %vm570_vm1, %v1248_v17, 0.0 }
 0x6a9   : > { %v1273_v49 = vadd.f32 %v2271_v10, %v1260_v14  ;;  %v1262_v24 = vadd.f32 %v1256_v37, %v1220_v40  ;;  %v1261_v5 = vadd.f32 %v1255_v51, %v1219_v15 }
 0x6aa   : > { %v1234_v29 = vpop.permute.xlu1 %1233 }
 0x6ab   : > { %v1275_v54 = vadd.f32 %v2271_v10, %v1262_v24  ;;  %v1274_v26 = vadd.f32 %v2271_v10, %v1261_v5  ;;  %v1246_v0 = vrot.slane %v1234_v29, 1  ;;  %v1279_v31 = vmul.f32 %v1273_v49, %v1935_v48 }
 0x6ad   : > { %v1280_v9 = vmul.f32 %v1274_v26, %v1957_v59  ;;  %v1247_v55 = vsel %vm542_vm8, %v1245_v30, %v1246_v0  ;;  %v1309_v27 = vmul.f32 %v1290_v34, %v1279_v31  ;;  %v1281_v25 = vmul.f32 %v1275_v54, %v1961_v61 }
 0x6ae   : > { %v1208_v58 = vpop.permute.xlu1 %1207  ;;  %v1257_v41 = vsel %vm571_vm3, %v1247_v55, 0.0  ;;  %v1252_v48 = vsel %vm542_vm8, %v1246_v0, %v1241_v39  ;;  %v1192_v34 = vsel %vm481_vm4, %v2256_v3, 0.0 }
 0x6af   : > { %v1221_v35 = vadd.f32 %v1208_v58, %v1191_v1  ;;  %v1315_v36 = vmax.f32 %v1309_v27, 0.0  ;;  %v1310_v8 = vmul.f32 %v1294_v16, %v1280_v9  ;;  %v1311_v16 = vmul.f32 %v2262_v42, %v1281_v25 }
 0x6b0   : > { %v1258_v60 = vsel %vm572_vm5, %v1252_v48, 0.0 }
 0x6b1   : > { %v1263_v22 = vadd.f32 %v1257_v41, %v1221_v35  ;;  %1321 = vxpose.xlu1.b32.cont [2/6] (short) (narrow) %v1315_v36, 8  ;;  %v1316_v32 = vmax.f32 %v1310_v8, 0.0  ;;  %v1317_v44 = vmax.f32 %v1311_v16, 0.0 }
 0x6b2   : > { %v1210_v59 = vpop.permute.xlu1 %1209 }
 0x6b3   : > { %v1222_v57 = vadd.f32 %v1210_v59, %v1192_v34  ;;  %v1276_v43 = vadd.f32 %v2271_v10, %v1263_v22 }
 0x6b5   : > { %v1264_v61 = vadd.f32 %v1258_v60, %v1222_v57  ;;  %1322 = vxpose.xlu1.b32.cont [3/6] (short) (narrow) %v1316_v32, 8  ;;  %v1282_v28 = vmul.f32 %v1276_v43, %v1965_v63  ;;  %v1302_v39 = vpop.permute.xlu0 %1301 }
 0x6b7   : > { %v1312_v21 = vmul.f32 %v1302_v39, %v1282_v28  ;;  %v1277_v56 = vadd.f32 %v2271_v10, %v1264_v61 }
 0x6b9   : > { %1323 = vxpose.xlu1.b32.cont [4/6] (short) (narrow) %v1317_v44, 8  ;;  %v1283_v3 = vmul.f32 %v1277_v56, %v2029_v18  ;;  %v1306_v2 = vpop.permute.xlu0 %1305  ;;  %v1318_v38 = vmax.f32 %v1312_v21, 0.0 }
 0x6bb   : > { %v1313_v42 = vmul.f32 %v1306_v2, %v1283_v3 }
 0x6bd   : > { %1324 = vxpose.xlu1.b32.cont [5/6] (short) (narrow) %v1318_v38, 8  ;;  %v1319_v62 = vmax.f32 %v1313_v42, 0.0 }
 0x6c1   : > { %1325 = vxpose.xlu1.b32.end [6/6] (short) (narrow) %v1319_v62, 8 }
 0x72d   : > { %v1336_v63 = vpop.trf.xlu1 }
 0x72e   : > { %1353 = vst.msk [vmem:[%s288_s20] sm:$0x3] %vm1352_vm0, %v1336_v63 }
 0x72f   : > { %1684 = shalt.err (!%p1681_p3)
}
 0x730   : > { %s1685_s15 = scalar_lea.hbm %s2324_s29, 32  ;;  %s1689_s18 = scalar_lea.hbm %s2373_s7, 64 }
 0x731   : > { %p1686_p4 = scmp.ne.s32.totalorder %s2324_s29, %s1685_s15  ;;  %p1690_p9 = scmp.lt.u32.totalorder %s2324_s29, %s2373_s7 }
 0x732   : > { %p1691_p10 = scmp.lt.u32.totalorder %s1689_s18, %s1685_s15  ;;  %p1693_p12 = scmp.lt.u32.totalorder %s1685_s15, %s2324_s29 }
 0x733   : > { %p1687_p7 = pnand %p1686_p4, %p1822_p5 }
 0x734   : > { %p1692_p11 = por %p1691_p10, %p1690_p9 }
 0x735   : > { %p1688_p8 = pneg %p1687_p7 }
 0x736   : > { %p1694_p13 = por %p1693_p12, %p1692_p11 }
 0x738   : > { %p1695_p0 = pnand %p1694_p13, %p1688_p8 }
 0x73a   : > { %1698 = shalt.err (!%p1695_p0)
}
 0x73b   : > { %1588 = dma.vmem_to_hbm [thread:$0]  (%p1822_p5), %s2326_s21, 32, %s2324_s29, %s1355_s8  }
 0x73c PF: > { %p1594_p1 = scmp.ge.s32.totalorder %s1733_s27, 2  ;;  %s1380_s22 = sand.u32 1, %s1721_s24  }
 0x73d   : > { %s1381_s23 = scalar_lea.sflag [#allocation3], %s1380_s22 }
 0x73e   : > { %p1591_p2 = pnand %p1594_p1, %p1826_p6 }
 0x740   : > { %1716 = dma.done.wait (!%p1591_p2), %s1381_s23, 32  }
 0x741   : > { %1718 = vsyncadd (!%p1591_p2), %s1381_s23, 4294967264  ;;  %p17_p3 = scmp.ge.s32.totalorder %s1809_s30, 4   ;;  %s2376_s24 = smov %s1725_s25 }
 0x742   : > { %s2377_s25 = smov %s1729_s26  ;;  %s2378_s26 = smov %s1820_s10 }
 0x743   : > { %s2379_s27 = smov %s1809_s30  ;;  %19 = sbr.rel (!%p17_p3) target bundleno = 3 (0x3), region = 89 }
 0x74a   :  { %1386 = vsyncpa [#allocation3], 1 }
 0x74b   :  { %1388 = vsyncpa [#allocation3 + $0x1], 1 }

</bundles_post_ra>
